<compile_context>
chip_gen: v6e
topology: v6e:2x2x1
jax: 0.10.0
libtpu: 0.0.40
codegen_flags: <defaults>
</compile_context>

<pallas_src>
import functools

import jax
import jax.numpy as jnp
from jax import lax
from jax.experimental import pallas as pl
from jax.experimental.pallas import tpu as pltpu


def _round_up(v, m):
    return ((v + m - 1) // m) * m


def _detcnnk_kernel(x_ref, w_ref, g_ref, bt_ref, m_ref, o_ref, *,
                    K, Wp, HpWp, TP, n_tiles, inv_count, eps, slope):
    # x_ref : (1, K*Cin, XP0)        kw-pre-shifted, zero-padded, flattened input
    # w_ref : (K*K, Cout_blk, K*Cin) per-(kd,kh) weight matrices, cols = (kw, cin)
    # g_ref : (1, P_pad)             LayerNorm gamma on the padded spatial grid
    # bt_ref: (1, P_pad)             LayerNorm beta  on the padded spatial grid
    # m_ref : (1, P_pad)             1.0 at valid (d<D,h<H,w<W) positions else 0
    # o_ref : (1, Cout_blk, P_pad)   output block (also used to park conv results)
    cb = o_ref.shape[1]

    s_tot = jnp.zeros((cb, 1), jnp.float32)   # masked sum
    q_tot = jnp.zeros((cb, 1), jnp.float32)   # masked sum of squares

    # ---- Pass 1: convolution, one spatial tile at a time --------------------
    # Accumulator is (cb, TP) and stays vreg-resident across the K^2 taps;
    # each finished tile is written exactly once into the output VMEM block.
    for t in range(n_tiles):
        p0 = t * TP                                    # static, 128-aligned
        acc = jnp.zeros((cb, TP), jnp.float32)
        for kd in range(K):
            for kh in range(K):
                # kw is folded into the contraction (rows of xs / cols of w).
                off = p0 + kd * HpWp + kh * Wp
                xs = x_ref[0, :, pl.ds(off, TP)]       # (K*Cin, TP)
                acc = acc + jnp.dot(w_ref[kd * K + kh], xs,
                                    preferred_element_type=jnp.float32)
        mask = m_ref[:, pl.ds(p0, TP)]                 # (1, TP)
        masked = acc * mask
        s_tot = s_tot + jnp.sum(masked, axis=1, keepdims=True)
        q_tot = q_tot + jnp.sum(masked * masked, axis=1, keepdims=True)
        o_ref[0, :, pl.ds(p0, TP)] = acc               # park conv result

    # ---- LayerNorm statistics (per (n, cout) channel over valid positions) --
    mean = s_tot * inv_count
    var = jnp.maximum(q_tot * inv_count - mean * mean, 0.0)
    scale = lax.rsqrt(var + eps)

    # ---- Pass 2: LN affine + LeakyReLU, one read + one write per tile -------
    for t in range(n_tiles):
        p0 = t * TP
        a = o_ref[0, :, pl.ds(p0, TP)]
        y = (a - mean) * scale
        y = y * g_ref[:, pl.ds(p0, TP)] + bt_ref[:, pl.ds(p0, TP)]
        o_ref[0, :, pl.ds(p0, TP)] = jnp.where(y >= 0, y, slope * y).astype(o_ref.dtype)


def det_cnn_k_forward(x, conv_w, conv_b, ln_w, ln_b, *, kernel_size, eps=1e-5,
                      slope=0.1):
    """x: (N, Cin, D, H, W) f32.  Returns (N, Cout, D, H, W) f32."""
    N, Cin, D, H, W = x.shape
    Cout = conv_w.shape[0]
    K = kernel_size
    assert K % 2 == 1, "only odd kernel_size keeps PyTorch 'same' output shape"
    pad = K // 2

    # Conv bias is a per-(n, cout) constant over the LayerNorm axes (D,H,W):
    # it is exactly cancelled by the mean subtraction, so it is dropped.
    del conv_b

    Dp, Hp, Wp = D + 2 * pad, H + 2 * pad, W + 2 * pad
    HpWp = Hp * Wp
    P = Dp * HpWp                       # padded flattened spatial extent
    DHW = D * H * W

    # Spatial (lane) tile width: keep the per-tile accumulator vreg-friendly,
    # but cap the unrolled tile count for large volumes.
    TP = 256
    while _round_up(P, TP) // TP > 64 and TP < 4096:
        TP *= 2
    P_pad = _round_up(P, TP)            # lane-dense output width (mult. of 128)
    n_tiles = P_pad // TP

    off_max = (K - 1) * (HpWp + Wp)     # only kd/kh offsets remain in-kernel
    XP0 = _round_up(P_pad + off_max, 128)
    XL = XP0 + (K - 1)
    KC = K * Cin

    # --- glue (O(K * input) HBM, small vs. the Cout-wide output) -------------
    # Zero-pad spatially, flatten, then pre-shift the kw axis onto the channel
    # (contraction) axis: xs[n, kw*Cin + ci, j] = xp[n, ci, j + kw].
    xp = jnp.pad(x, ((0, 0), (0, 0), (pad, pad), (pad, pad), (pad, pad)))
    xp = xp.reshape(N, Cin, P)
    xp = jnp.pad(xp, ((0, 0), (0, 0), (0, XL - P)))
    xs = jnp.stack([xp[:, :, kw:kw + XP0] for kw in range(K)], axis=1)
    xs = xs.reshape(N, KC, XP0).astype(jnp.float32)

    # Per-(kd,kh) weight matrices (K*K, Cout, K*Cin); columns ordered (kw, cin)
    # to match the stacked operand layout.
    w_taps = jnp.transpose(conv_w, (2, 3, 0, 4, 1)).reshape(K * K, Cout, KC)
    w_taps = w_taps.astype(jnp.float32)

    # LayerNorm affine + validity mask on the padded spatial grid.
    def _pad_spatial(a):
        a = jnp.pad(a, ((0, 2 * pad), (0, 2 * pad), (0, 2 * pad))).reshape(1, P)
        return jnp.pad(a, ((0, 0), (0, P_pad - P))).astype(jnp.float32)

    gamma_p = _pad_spatial(ln_w)
    beta_p = _pad_spatial(ln_b)
    mask_p = _pad_spatial(jnp.ones((D, H, W), jnp.float32))

    # Cout blocking: largest divisor <= 128 (handles Cout % 128 != 0, keeps the
    # output block bounded, and yields >= 2 parallel grid steps in typical
    # configs so both v7x TensorCores get work).
    block_cout = Cout
    for b in (128, 64, 32, 16, 8):
        if Cout % b == 0:
            block_cout = b
            break
    n_cblk = Cout // block_cout

    kern = functools.partial(
        _detcnnk_kernel, K=K, Wp=Wp, HpWp=HpWp, TP=TP, n_tiles=n_tiles,
        inv_count=1.0 / float(DHW), eps=eps, slope=slope)

    # Scoped-VMEM budget derived from the actual double-buffered block sizes
    # (+ slack for in-kernel temporaries), clamped to [32 MiB, 100 MiB].
    bytes_blocks = 4 * (2 * KC * XP0
                        + 2 * K * K * block_cout * KC
                        + 2 * 3 * P_pad
                        + 2 * block_cout * P_pad)
    vmem_limit = int(min(max(bytes_blocks + (8 << 20), 32 << 20), 100 << 20))

    out = pl.pallas_call(
        kern,
        out_shape=jax.ShapeDtypeStruct((N, Cout, P_pad), jnp.float32),
        grid=(N, n_cblk),
        in_specs=[
            pl.BlockSpec((1, KC, XP0), lambda n, c: (n, 0, 0)),
            pl.BlockSpec((K * K, block_cout, KC), lambda n, c: (0, c, 0)),
            pl.BlockSpec((1, P_pad), lambda n, c: (0, 0)),
            pl.BlockSpec((1, P_pad), lambda n, c: (0, 0)),
            pl.BlockSpec((1, P_pad), lambda n, c: (0, 0)),
        ],
        out_specs=pl.BlockSpec((1, block_cout, P_pad), lambda n, c: (n, c, 0)),
        compiler_params=pltpu.CompilerParams(
            dimension_semantics=("parallel", "parallel"),
            vmem_limit_bytes=vmem_limit),
    )(xs, w_taps, gamma_p, beta_p, mask_p)

    # Extract the interior (valid) spatial positions back to NCDHW.
    out = out[:, :, :P].reshape(N, Cout, Dp, Hp, Wp)[:, :, :D, :H, :W]
    return out


def _reference(x, conv_w, conv_b, ln_w, ln_b, *, kernel_size, eps=1e-5,
               slope=0.1):
    pad = kernel_size // 2
    c = lax.conv_general_dilated(
        x, conv_w, window_strides=(1, 1, 1),
        padding=[(pad, pad)] * 3,
        dimension_numbers=("NCDHW", "OIDHW", "NCDHW"),
        precision=lax.Precision.HIGHEST)
    c = c + conv_b[None, :, None, None, None]
    mean = jnp.mean(c, axis=(2, 3, 4), keepdims=True)
    var = jnp.mean((c - mean) ** 2, axis=(2, 3, 4), keepdims=True)
    n = (c - mean) * lax.rsqrt(var + eps)
    n = n * ln_w[None, None] + ln_b[None, None]
    return jnp.where(n >= 0, n, slope * n)


if __name__ == "__main__":
    # Small shapes consistent with DetCNNK(in_features=4, img_shape=(8,8,8),
    # out_features=8, kernel_size=3).
    N, Cin, Cout = 2, 4, 8
    D = H = W = 8
    K = 3

    key = jax.random.PRNGKey(0)
    kx, kw, kb = jax.random.split(key, 3)

    x = jax.random.normal(kx, (N, Cin, D, H, W), jnp.float32)

    # Deterministic parameter init (PyTorch-like uniform(-1/sqrt(fan_in), ..)).
    fan_in = Cin * K ** 3
    bound = 1.0 / (fan_in ** 0.5)
    conv_w = jax.random.uniform(kw, (Cout, Cin, K, K, K), jnp.float32,
                                -bound, bound)
    conv_b = jax.random.uniform(kb, (Cout,), jnp.float32, -bound, bound)
    # nn.LayerNorm(img_shape) init: weight=1, bias=0 over img_shape=(D,H,W).
    ln_w = jnp.ones((D, H, W), jnp.float32)
    ln_b = jnp.zeros((D, H, W), jnp.float32)

    out = det_cnn_k_forward(x, conv_w, conv_b, ln_w, ln_b, kernel_size=K)
    out = jax.block_until_ready(out)

    ref = _reference(x, conv_w, conv_b, ln_w, ln_b, kernel_size=K)
    assert out.shape == (N, Cout, D, H, W)
    assert jnp.allclose(out, ref, atol=2e-3, rtol=2e-3), (
        float(jnp.max(jnp.abs(out - ref))))

    print("KERNEL_OK")
</pallas_src>

<mosaic_0001>
module attributes {stable_mosaic.version = 11 : i64} {
  func.func @_detcnnk_kernel(%arg0: i32, %arg1: i32, %arg2: memref<1x12x1280xf32, #tpu.memory_space<vmem>>, %arg3: memref<9x8x12xf32, #tpu.memory_space<vmem>>, %arg4: memref<1x1024xf32, #tpu.memory_space<vmem>>, %arg5: memref<1x1024xf32, #tpu.memory_space<vmem>>, %arg6: memref<1x1024xf32, #tpu.memory_space<vmem>>, %arg7: memref<1x8x1024xf32, #tpu.memory_space<vmem>>) attributes {dimension_semantics = [#tpu.dimension_semantics<parallel>, #tpu.dimension_semantics<parallel>], iteration_bounds = array<i64: 2, 1>, scalar_prefetch = 0 : i64, scratch_operands = 0 : i64, tpu.core_type = #tpu.core_type<tc>, window_params = [{transform_indices = @transform_0, window_bounds = array<i64: 1, 12, 1280>}, {transform_indices = @transform_1, window_bounds = array<i64: 9, 8, 12>}, {pipeline_mode = #tpu.pipeline_mode<synchronous>, transform_indices = @transform_2, window_bounds = array<i64: 1, 1024>}, {pipeline_mode = #tpu.pipeline_mode<synchronous>, transform_indices = @transform_3, window_bounds = array<i64: 1, 1024>}, {pipeline_mode = #tpu.pipeline_mode<synchronous>, transform_indices = @transform_4, window_bounds = array<i64: 1, 1024>}, {transform_indices = @transform_5, window_bounds = array<i64: 1, 8, 1024>}]} {
    %cst = arith.constant 0.000000e+00 : f32
    %0 = vector.broadcast %cst : f32 to vector<8x1xf32>
    %cst_0 = arith.constant 0.000000e+00 : f32
    %1 = vector.broadcast %cst_0 : f32 to vector<8x1xf32>
    %cst_1 = arith.constant 0.000000e+00 : f32
    %2 = vector.broadcast %cst_1 : f32 to vector<8x256xf32>
    %c0 = arith.constant 0 : index
    %c0_2 = arith.constant 0 : index
    %c0_3 = arith.constant 0 : index
    %3 = vector.load %arg2[%c0, %c0_2, %c0_3] : memref<1x12x1280xf32, #tpu.memory_space<vmem>>, vector<1x12x256xf32>
    %4 = vector.shape_cast %3 : vector<1x12x256xf32> to vector<12x256xf32>
    %c0_4 = arith.constant 0 : index
    %c0_5 = arith.constant 0 : index
    %c0_6 = arith.constant 0 : index
    %5 = vector.load %arg3[%c0_4, %c0_5, %c0_6] : memref<9x8x12xf32, #tpu.memory_space<vmem>>, vector<1x8x12xf32>
    %6 = vector.shape_cast %5 : vector<1x8x12xf32> to vector<8x12xf32>
    %cst_7 = arith.constant dense<0.000000e+00> : vector<8x256xf32>
    %7 = tpu.matmul %6, %4, %cst_7 {dimension_numbers = #tpu.dot_dimension_numbers<[1], [0], [0], [1], [0, 0, 1, 1], [], []>} : vector<8x12xf32>, vector<12x256xf32>, vector<8x256xf32> -> vector<8x256xf32>
    %8 = arith.addf %2, %7 : vector<8x256xf32>
    %c0_8 = arith.constant 0 : index
    %c0_9 = arith.constant 0 : index
    %c10 = arith.constant 10 : index
    %9 = vector.load %arg2[%c0_8, %c0_9, %c10] : memref<1x12x1280xf32, #tpu.memory_space<vmem>>, vector<1x12x256xf32>
    %10 = vector.shape_cast %9 : vector<1x12x256xf32> to vector<12x256xf32>
    %c1 = arith.constant 1 : index
    %c0_10 = arith.constant 0 : index
    %c0_11 = arith.constant 0 : index
    %11 = vector.load %arg3[%c1, %c0_10, %c0_11] : memref<9x8x12xf32, #tpu.memory_space<vmem>>, vector<1x8x12xf32>
    %12 = vector.shape_cast %11 : vector<1x8x12xf32> to vector<8x12xf32>
    %cst_12 = arith.constant dense<0.000000e+00> : vector<8x256xf32>
    %13 = tpu.matmul %12, %10, %cst_12 {dimension_numbers = #tpu.dot_dimension_numbers<[1], [0], [0], [1], [0, 0, 1, 1], [], []>} : vector<8x12xf32>, vector<12x256xf32>, vector<8x256xf32> -> vector<8x256xf32>
    %14 = arith.addf %8, %13 : vector<8x256xf32>
    %c0_13 = arith.constant 0 : index
    %c0_14 = arith.constant 0 : index
    %c20 = arith.constant 20 : index
    %15 = vector.load %arg2[%c0_13, %c0_14, %c20] : memref<1x12x1280xf32, #tpu.memory_space<vmem>>, vector<1x12x256xf32>
    %16 = vector.shape_cast %15 : vector<1x12x256xf32> to vector<12x256xf32>
    %c2 = arith.constant 2 : index
    %c0_15 = arith.constant 0 : index
    %c0_16 = arith.constant 0 : index
    %17 = vector.load %arg3[%c2, %c0_15, %c0_16] : memref<9x8x12xf32, #tpu.memory_space<vmem>>, vector<1x8x12xf32>
    %18 = vector.shape_cast %17 : vector<1x8x12xf32> to vector<8x12xf32>
    %cst_17 = arith.constant dense<0.000000e+00> : vector<8x256xf32>
    %19 = tpu.matmul %18, %16, %cst_17 {dimension_numbers = #tpu.dot_dimension_numbers<[1], [0], [0], [1], [0, 0, 1, 1], [], []>} : vector<8x12xf32>, vector<12x256xf32>, vector<8x256xf32> -> vector<8x256xf32>
    %20 = arith.addf %14, %19 : vector<8x256xf32>
    %c0_18 = arith.constant 0 : index
    %c0_19 = arith.constant 0 : index
    %c100 = arith.constant 100 : index
    %21 = vector.load %arg2[%c0_18, %c0_19, %c100] : memref<1x12x1280xf32, #tpu.memory_space<vmem>>, vector<1x12x256xf32>
    %22 = vector.shape_cast %21 : vector<1x12x256xf32> to vector<12x256xf32>
    %c3 = arith.constant 3 : index
    %c0_20 = arith.constant 0 : index
    %c0_21 = arith.constant 0 : index
    %23 = vector.load %arg3[%c3, %c0_20, %c0_21] : memref<9x8x12xf32, #tpu.memory_space<vmem>>, vector<1x8x12xf32>
    %24 = vector.shape_cast %23 : vector<1x8x12xf32> to vector<8x12xf32>
    %cst_22 = arith.constant dense<0.000000e+00> : vector<8x256xf32>
    %25 = tpu.matmul %24, %22, %cst_22 {dimension_numbers = #tpu.dot_dimension_numbers<[1], [0], [0], [1], [0, 0, 1, 1], [], []>} : vector<8x12xf32>, vector<12x256xf32>, vector<8x256xf32> -> vector<8x256xf32>
    %26 = arith.addf %20, %25 : vector<8x256xf32>
    %c0_23 = arith.constant 0 : index
    %c0_24 = arith.constant 0 : index
    %c110 = arith.constant 110 : index
    %27 = vector.load %arg2[%c0_23, %c0_24, %c110] : memref<1x12x1280xf32, #tpu.memory_space<vmem>>, vector<1x12x256xf32>
    %28 = vector.shape_cast %27 : vector<1x12x256xf32> to vector<12x256xf32>
    %c4 = arith.constant 4 : index
    %c0_25 = arith.constant 0 : index
    %c0_26 = arith.constant 0 : index
    %29 = vector.load %arg3[%c4, %c0_25, %c0_26] : memref<9x8x12xf32, #tpu.memory_space<vmem>>, vector<1x8x12xf32>
    %30 = vector.shape_cast %29 : vector<1x8x12xf32> to vector<8x12xf32>
    %cst_27 = arith.constant dense<0.000000e+00> : vector<8x256xf32>
    %31 = tpu.matmul %30, %28, %cst_27 {dimension_numbers = #tpu.dot_dimension_numbers<[1], [0], [0], [1], [0, 0, 1, 1], [], []>} : vector<8x12xf32>, vector<12x256xf32>, vector<8x256xf32> -> vector<8x256xf32>
    %32 = arith.addf %26, %31 : vector<8x256xf32>
    %c0_28 = arith.constant 0 : index
    %c0_29 = arith.constant 0 : index
    %c120 = arith.constant 120 : index
    %33 = vector.load %arg2[%c0_28, %c0_29, %c120] : memref<1x12x1280xf32, #tpu.memory_space<vmem>>, vector<1x12x256xf32>
    %34 = vector.shape_cast %33 : vector<1x12x256xf32> to vector<12x256xf32>
    %c5 = arith.constant 5 : index
    %c0_30 = arith.constant 0 : index
    %c0_31 = arith.constant 0 : index
    %35 = vector.load %arg3[%c5, %c0_30, %c0_31] : memref<9x8x12xf32, #tpu.memory_space<vmem>>, vector<1x8x12xf32>
    %36 = vector.shape_cast %35 : vector<1x8x12xf32> to vector<8x12xf32>
    %cst_32 = arith.constant dense<0.000000e+00> : vector<8x256xf32>
    %37 = tpu.matmul %36, %34, %cst_32 {dimension_numbers = #tpu.dot_dimension_numbers<[1], [0], [0], [1], [0, 0, 1, 1], [], []>} : vector<8x12xf32>, vector<12x256xf32>, vector<8x256xf32> -> vector<8x256xf32>
    %38 = arith.addf %32, %37 : vector<8x256xf32>
    %c0_33 = arith.constant 0 : index
    %c0_34 = arith.constant 0 : index
    %c200 = arith.constant 200 : index
    %39 = vector.load %arg2[%c0_33, %c0_34, %c200] : memref<1x12x1280xf32, #tpu.memory_space<vmem>>, vector<1x12x256xf32>
    %40 = vector.shape_cast %39 : vector<1x12x256xf32> to vector<12x256xf32>
    %c6 = arith.constant 6 : index
    %c0_35 = arith.constant 0 : index
    %c0_36 = arith.constant 0 : index
    %41 = vector.load %arg3[%c6, %c0_35, %c0_36] : memref<9x8x12xf32, #tpu.memory_space<vmem>>, vector<1x8x12xf32>
    %42 = vector.shape_cast %41 : vector<1x8x12xf32> to vector<8x12xf32>
    %cst_37 = arith.constant dense<0.000000e+00> : vector<8x256xf32>
    %43 = tpu.matmul %42, %40, %cst_37 {dimension_numbers = #tpu.dot_dimension_numbers<[1], [0], [0], [1], [0, 0, 1, 1], [], []>} : vector<8x12xf32>, vector<12x256xf32>, vector<8x256xf32> -> vector<8x256xf32>
    %44 = arith.addf %38, %43 : vector<8x256xf32>
    %c0_38 = arith.constant 0 : index
    %c0_39 = arith.constant 0 : index
    %c210 = arith.constant 210 : index
    %45 = vector.load %arg2[%c0_38, %c0_39, %c210] : memref<1x12x1280xf32, #tpu.memory_space<vmem>>, vector<1x12x256xf32>
    %46 = vector.shape_cast %45 : vector<1x12x256xf32> to vector<12x256xf32>
    %c7 = arith.constant 7 : index
    %c0_40 = arith.constant 0 : index
    %c0_41 = arith.constant 0 : index
    %47 = vector.load %arg3[%c7, %c0_40, %c0_41] : memref<9x8x12xf32, #tpu.memory_space<vmem>>, vector<1x8x12xf32>
    %48 = vector.shape_cast %47 : vector<1x8x12xf32> to vector<8x12xf32>
    %cst_42 = arith.constant dense<0.000000e+00> : vector<8x256xf32>
    %49 = tpu.matmul %48, %46, %cst_42 {dimension_numbers = #tpu.dot_dimension_numbers<[1], [0], [0], [1], [0, 0, 1, 1], [], []>} : vector<8x12xf32>, vector<12x256xf32>, vector<8x256xf32> -> vector<8x256xf32>
    %50 = arith.addf %44, %49 : vector<8x256xf32>
    %c0_43 = arith.constant 0 : index
    %c0_44 = arith.constant 0 : index
    %c220 = arith.constant 220 : index
    %51 = vector.load %arg2[%c0_43, %c0_44, %c220] : memref<1x12x1280xf32, #tpu.memory_space<vmem>>, vector<1x12x256xf32>
    %52 = vector.shape_cast %51 : vector<1x12x256xf32> to vector<12x256xf32>
    %c8 = arith.constant 8 : index
    %c0_45 = arith.constant 0 : index
    %c0_46 = arith.constant 0 : index
    %53 = vector.load %arg3[%c8, %c0_45, %c0_46] : memref<9x8x12xf32, #tpu.memory_space<vmem>>, vector<1x8x12xf32>
    %54 = vector.shape_cast %53 : vector<1x8x12xf32> to vector<8x12xf32>
    %cst_47 = arith.constant dense<0.000000e+00> : vector<8x256xf32>
    %55 = tpu.matmul %54, %52, %cst_47 {dimension_numbers = #tpu.dot_dimension_numbers<[1], [0], [0], [1], [0, 0, 1, 1], [], []>} : vector<8x12xf32>, vector<12x256xf32>, vector<8x256xf32> -> vector<8x256xf32>
    %56 = arith.addf %50, %55 : vector<8x256xf32>
    %c0_48 = arith.constant 0 : index
    %c0_49 = arith.constant 0 : index
    %57 = vector.load %arg6[%c0_48, %c0_49] : memref<1x1024xf32, #tpu.memory_space<vmem>>, vector<1x256xf32>
    %58 = vector.broadcast %57 : vector<1x256xf32> to vector<8x256xf32>
    %59 = arith.mulf %56, %58 : vector<8x256xf32>
    %cst_50 = arith.constant dense<0.000000e+00> : vector<8xf32>
    %60 = vector.multi_reduction <add>, %59, %cst_50 [1] : vector<8x256xf32> to vector<8xf32>
    %61 = vector.shape_cast %60 : vector<8xf32> to vector<8x1xf32>
    %62 = arith.addf %0, %61 : vector<8x1xf32>
    %63 = arith.mulf %59, %59 : vector<8x256xf32>
    %cst_51 = arith.constant dense<0.000000e+00> : vector<8xf32>
    %64 = vector.multi_reduction <add>, %63, %cst_51 [1] : vector<8x256xf32> to vector<8xf32>
    %65 = vector.shape_cast %64 : vector<8xf32> to vector<8x1xf32>
    %66 = arith.addf %1, %65 : vector<8x1xf32>
    %c0_52 = arith.constant 0 : index
    %c0_53 = arith.constant 0 : index
    %c0_54 = arith.constant 0 : index
    %67 = vector.load %arg7[%c0_52, %c0_53, %c0_54] : memref<1x8x1024xf32, #tpu.memory_space<vmem>>, vector<1x8x256xf32>
    %68 = vector.shape_cast %67 : vector<1x8x256xf32> to vector<8x256xf32>
    %69 = vector.shape_cast %56 : vector<8x256xf32> to vector<1x8x256xf32>
    tpu.vector_store %arg7[%c0_52, %c0_53, %c0_54], %69 {strides = array<i32>} : memref<1x8x1024xf32, #tpu.memory_space<vmem>>, vector<1x8x256xf32>,
    %cst_55 = arith.constant 0.000000e+00 : f32
    %70 = vector.broadcast %cst_55 : f32 to vector<8x256xf32>
    %c0_56 = arith.constant 0 : index
    %c0_57 = arith.constant 0 : index
    %c256 = arith.constant 256 : index
    %71 = vector.load %arg2[%c0_56, %c0_57, %c256] : memref<1x12x1280xf32, #tpu.memory_space<vmem>>, vector<1x12x256xf32>
    %72 = vector.shape_cast %71 : vector<1x12x256xf32> to vector<12x256xf32>
    %c0_58 = arith.constant 0 : index
    %c0_59 = arith.constant 0 : index
    %c0_60 = arith.constant 0 : index
    %73 = vector.load %arg3[%c0_58, %c0_59, %c0_60] : memref<9x8x12xf32, #tpu.memory_space<vmem>>, vector<1x8x12xf32>
    %74 = vector.shape_cast %73 : vector<1x8x12xf32> to vector<8x12xf32>
    %cst_61 = arith.constant dense<0.000000e+00> : vector<8x256xf32>
    %75 = tpu.matmul %74, %72, %cst_61 {dimension_numbers = #tpu.dot_dimension_numbers<[1], [0], [0], [1], [0, 0, 1, 1], [], []>} : vector<8x12xf32>, vector<12x256xf32>, vector<8x256xf32> -> vector<8x256xf32>
    %76 = arith.addf %70, %75 : vector<8x256xf32>
    %c0_62 = arith.constant 0 : index
    %c0_63 = arith.constant 0 : index
    %c266 = arith.constant 266 : index
    %77 = vector.load %arg2[%c0_62, %c0_63, %c266] : memref<1x12x1280xf32, #tpu.memory_space<vmem>>, vector<1x12x256xf32>
    %78 = vector.shape_cast %77 : vector<1x12x256xf32> to vector<12x256xf32>
    %c1_64 = arith.constant 1 : index
    %c0_65 = arith.constant 0 : index
    %c0_66 = arith.constant 0 : index
    %79 = vector.load %arg3[%c1_64, %c0_65, %c0_66] : memref<9x8x12xf32, #tpu.memory_space<vmem>>, vector<1x8x12xf32>
    %80 = vector.shape_cast %79 : vector<1x8x12xf32> to vector<8x12xf32>
    %cst_67 = arith.constant dense<0.000000e+00> : vector<8x256xf32>
    %81 = tpu.matmul %80, %78, %cst_67 {dimension_numbers = #tpu.dot_dimension_numbers<[1], [0], [0], [1], [0, 0, 1, 1], [], []>} : vector<8x12xf32>, vector<12x256xf32>, vector<8x256xf32> -> vector<8x256xf32>
    %82 = arith.addf %76, %81 : vector<8x256xf32>
    %c0_68 = arith.constant 0 : index
    %c0_69 = arith.constant 0 : index
    %c276 = arith.constant 276 : index
    %83 = vector.load %arg2[%c0_68, %c0_69, %c276] : memref<1x12x1280xf32, #tpu.memory_space<vmem>>, vector<1x12x256xf32>
    %84 = vector.shape_cast %83 : vector<1x12x256xf32> to vector<12x256xf32>
    %c2_70 = arith.constant 2 : index
    %c0_71 = arith.constant 0 : index
    %c0_72 = arith.constant 0 : index
    %85 = vector.load %arg3[%c2_70, %c0_71, %c0_72] : memref<9x8x12xf32, #tpu.memory_space<vmem>>, vector<1x8x12xf32>
    %86 = vector.shape_cast %85 : vector<1x8x12xf32> to vector<8x12xf32>
    %cst_73 = arith.constant dense<0.000000e+00> : vector<8x256xf32>
    %87 = tpu.matmul %86, %84, %cst_73 {dimension_numbers = #tpu.dot_dimension_numbers<[1], [0], [0], [1], [0, 0, 1, 1], [], []>} : vector<8x12xf32>, vector<12x256xf32>, vector<8x256xf32> -> vector<8x256xf32>
    %88 = arith.addf %82, %87 : vector<8x256xf32>
    %c0_74 = arith.constant 0 : index
    %c0_75 = arith.constant 0 : index
    %c356 = arith.constant 356 : index
    %89 = vector.load %arg2[%c0_74, %c0_75, %c356] : memref<1x12x1280xf32, #tpu.memory_space<vmem>>, vector<1x12x256xf32>
    %90 = vector.shape_cast %89 : vector<1x12x256xf32> to vector<12x256xf32>
    %c3_76 = arith.constant 3 : index
    %c0_77 = arith.constant 0 : index
    %c0_78 = arith.constant 0 : index
    %91 = vector.load %arg3[%c3_76, %c0_77, %c0_78] : memref<9x8x12xf32, #tpu.memory_space<vmem>>, vector<1x8x12xf32>
    %92 = vector.shape_cast %91 : vector<1x8x12xf32> to vector<8x12xf32>
    %cst_79 = arith.constant dense<0.000000e+00> : vector<8x256xf32>
    %93 = tpu.matmul %92, %90, %cst_79 {dimension_numbers = #tpu.dot_dimension_numbers<[1], [0], [0], [1], [0, 0, 1, 1], [], []>} : vector<8x12xf32>, vector<12x256xf32>, vector<8x256xf32> -> vector<8x256xf32>
    %94 = arith.addf %88, %93 : vector<8x256xf32>
    %c0_80 = arith.constant 0 : index
    %c0_81 = arith.constant 0 : index
    %c366 = arith.constant 366 : index
    %95 = vector.load %arg2[%c0_80, %c0_81, %c366] : memref<1x12x1280xf32, #tpu.memory_space<vmem>>, vector<1x12x256xf32>
    %96 = vector.shape_cast %95 : vector<1x12x256xf32> to vector<12x256xf32>
    %c4_82 = arith.constant 4 : index
    %c0_83 = arith.constant 0 : index
    %c0_84 = arith.constant 0 : index
    %97 = vector.load %arg3[%c4_82, %c0_83, %c0_84] : memref<9x8x12xf32, #tpu.memory_space<vmem>>, vector<1x8x12xf32>
    %98 = vector.shape_cast %97 : vector<1x8x12xf32> to vector<8x12xf32>
    %cst_85 = arith.constant dense<0.000000e+00> : vector<8x256xf32>
    %99 = tpu.matmul %98, %96, %cst_85 {dimension_numbers = #tpu.dot_dimension_numbers<[1], [0], [0], [1], [0, 0, 1, 1], [], []>} : vector<8x12xf32>, vector<12x256xf32>, vector<8x256xf32> -> vector<8x256xf32>
    %100 = arith.addf %94, %99 : vector<8x256xf32>
    %c0_86 = arith.constant 0 : index
    %c0_87 = arith.constant 0 : index
    %c376 = arith.constant 376 : index
    %101 = vector.load %arg2[%c0_86, %c0_87, %c376] : memref<1x12x1280xf32, #tpu.memory_space<vmem>>, vector<1x12x256xf32>
    %102 = vector.shape_cast %101 : vector<1x12x256xf32> to vector<12x256xf32>
    %c5_88 = arith.constant 5 : index
    %c0_89 = arith.constant 0 : index
    %c0_90 = arith.constant 0 : index
    %103 = vector.load %arg3[%c5_88, %c0_89, %c0_90] : memref<9x8x12xf32, #tpu.memory_space<vmem>>, vector<1x8x12xf32>
    %104 = vector.shape_cast %103 : vector<1x8x12xf32> to vector<8x12xf32>
    %cst_91 = arith.constant dense<0.000000e+00> : vector<8x256xf32>
    %105 = tpu.matmul %104, %102, %cst_91 {dimension_numbers = #tpu.dot_dimension_numbers<[1], [0], [0], [1], [0, 0, 1, 1], [], []>} : vector<8x12xf32>, vector<12x256xf32>, vector<8x256xf32> -> vector<8x256xf32>
    %106 = arith.addf %100, %105 : vector<8x256xf32>
    %c0_92 = arith.constant 0 : index
    %c0_93 = arith.constant 0 : index
    %c456 = arith.constant 456 : index
    %107 = vector.load %arg2[%c0_92, %c0_93, %c456] : memref<1x12x1280xf32, #tpu.memory_space<vmem>>, vector<1x12x256xf32>
    %108 = vector.shape_cast %107 : vector<1x12x256xf32> to vector<12x256xf32>
    %c6_94 = arith.constant 6 : index
    %c0_95 = arith.constant 0 : index
    %c0_96 = arith.constant 0 : index
    %109 = vector.load %arg3[%c6_94, %c0_95, %c0_96] : memref<9x8x12xf32, #tpu.memory_space<vmem>>, vector<1x8x12xf32>
    %110 = vector.shape_cast %109 : vector<1x8x12xf32> to vector<8x12xf32>
    %cst_97 = arith.constant dense<0.000000e+00> : vector<8x256xf32>
    %111 = tpu.matmul %110, %108, %cst_97 {dimension_numbers = #tpu.dot_dimension_numbers<[1], [0], [0], [1], [0, 0, 1, 1], [], []>} : vector<8x12xf32>, vector<12x256xf32>, vector<8x256xf32> -> vector<8x256xf32>
    %112 = arith.addf %106, %111 : vector<8x256xf32>
    %c0_98 = arith.constant 0 : index
    %c0_99 = arith.constant 0 : index
    %c466 = arith.constant 466 : index
    %113 = vector.load %arg2[%c0_98, %c0_99, %c466] : memref<1x12x1280xf32, #tpu.memory_space<vmem>>, vector<1x12x256xf32>
    %114 = vector.shape_cast %113 : vector<1x12x256xf32> to vector<12x256xf32>
    %c7_100 = arith.constant 7 : index
    %c0_101 = arith.constant 0 : index
    %c0_102 = arith.constant 0 : index
    %115 = vector.load %arg3[%c7_100, %c0_101, %c0_102] : memref<9x8x12xf32, #tpu.memory_space<vmem>>, vector<1x8x12xf32>
    %116 = vector.shape_cast %115 : vector<1x8x12xf32> to vector<8x12xf32>
    %cst_103 = arith.constant dense<0.000000e+00> : vector<8x256xf32>
    %117 = tpu.matmul %116, %114, %cst_103 {dimension_numbers = #tpu.dot_dimension_numbers<[1], [0], [0], [1], [0, 0, 1, 1], [], []>} : vector<8x12xf32>, vector<12x256xf32>, vector<8x256xf32> -> vector<8x256xf32>
    %118 = arith.addf %112, %117 : vector<8x256xf32>
    %c0_104 = arith.constant 0 : index
    %c0_105 = arith.constant 0 : index
    %c476 = arith.constant 476 : index
    %119 = vector.load %arg2[%c0_104, %c0_105, %c476] : memref<1x12x1280xf32, #tpu.memory_space<vmem>>, vector<1x12x256xf32>
    %120 = vector.shape_cast %119 : vector<1x12x256xf32> to vector<12x256xf32>
    %c8_106 = arith.constant 8 : index
    %c0_107 = arith.constant 0 : index
    %c0_108 = arith.constant 0 : index
    %121 = vector.load %arg3[%c8_106, %c0_107, %c0_108] : memref<9x8x12xf32, #tpu.memory_space<vmem>>, vector<1x8x12xf32>
    %122 = vector.shape_cast %121 : vector<1x8x12xf32> to vector<8x12xf32>
    %cst_109 = arith.constant dense<0.000000e+00> : vector<8x256xf32>
    %123 = tpu.matmul %122, %120, %cst_109 {dimension_numbers = #tpu.dot_dimension_numbers<[1], [0], [0], [1], [0, 0, 1, 1], [], []>} : vector<8x12xf32>, vector<12x256xf32>, vector<8x256xf32> -> vector<8x256xf32>
    %124 = arith.addf %118, %123 : vector<8x256xf32>
    %c0_110 = arith.constant 0 : index
    %c256_111 = arith.constant 256 : index
    %125 = vector.load %arg6[%c0_110, %c256_111] : memref<1x1024xf32, #tpu.memory_space<vmem>>, vector<1x256xf32>
    %126 = vector.broadcast %125 : vector<1x256xf32> to vector<8x256xf32>
    %127 = arith.mulf %124, %126 : vector<8x256xf32>
    %cst_112 = arith.constant dense<0.000000e+00> : vector<8xf32>
    %128 = vector.multi_reduction <add>, %127, %cst_112 [1] : vector<8x256xf32> to vector<8xf32>
    %129 = vector.shape_cast %128 : vector<8xf32> to vector<8x1xf32>
    %130 = arith.addf %62, %129 : vector<8x1xf32>
    %131 = arith.mulf %127, %127 : vector<8x256xf32>
    %cst_113 = arith.constant dense<0.000000e+00> : vector<8xf32>
    %132 = vector.multi_reduction <add>, %131, %cst_113 [1] : vector<8x256xf32> to vector<8xf32>
    %133 = vector.shape_cast %132 : vector<8xf32> to vector<8x1xf32>
    %134 = arith.addf %66, %133 : vector<8x1xf32>
    %c0_114 = arith.constant 0 : index
    %c0_115 = arith.constant 0 : index
    %c256_116 = arith.constant 256 : index
    %135 = vector.load %arg7[%c0_114, %c0_115, %c256_116] : memref<1x8x1024xf32, #tpu.memory_space<vmem>>, vector<1x8x256xf32>
    %136 = vector.shape_cast %135 : vector<1x8x256xf32> to vector<8x256xf32>
    %137 = vector.shape_cast %124 : vector<8x256xf32> to vector<1x8x256xf32>
    tpu.vector_store %arg7[%c0_114, %c0_115, %c256_116], %137 {strides = array<i32>} : memref<1x8x1024xf32, #tpu.memory_space<vmem>>, vector<1x8x256xf32>,
    %cst_117 = arith.constant 0.000000e+00 : f32
    %138 = vector.broadcast %cst_117 : f32 to vector<8x256xf32>
    %c0_118 = arith.constant 0 : index
    %c0_119 = arith.constant 0 : index
    %c512 = arith.constant 512 : index
    %139 = vector.load %arg2[%c0_118, %c0_119, %c512] : memref<1x12x1280xf32, #tpu.memory_space<vmem>>, vector<1x12x256xf32>
    %140 = vector.shape_cast %139 : vector<1x12x256xf32> to vector<12x256xf32>
    %c0_120 = arith.constant 0 : index
    %c0_121 = arith.constant 0 : index
    %c0_122 = arith.constant 0 : index
    %141 = vector.load %arg3[%c0_120, %c0_121, %c0_122] : memref<9x8x12xf32, #tpu.memory_space<vmem>>, vector<1x8x12xf32>
    %142 = vector.shape_cast %141 : vector<1x8x12xf32> to vector<8x12xf32>
    %cst_123 = arith.constant dense<0.000000e+00> : vector<8x256xf32>
    %143 = tpu.matmul %142, %140, %cst_123 {dimension_numbers = #tpu.dot_dimension_numbers<[1], [0], [0], [1], [0, 0, 1, 1], [], []>} : vector<8x12xf32>, vector<12x256xf32>, vector<8x256xf32> -> vector<8x256xf32>
    %144 = arith.addf %138, %143 : vector<8x256xf32>
    %c0_124 = arith.constant 0 : index
    %c0_125 = arith.constant 0 : index
    %c522 = arith.constant 522 : index
    %145 = vector.load %arg2[%c0_124, %c0_125, %c522] : memref<1x12x1280xf32, #tpu.memory_space<vmem>>, vector<1x12x256xf32>
    %146 = vector.shape_cast %145 : vector<1x12x256xf32> to vector<12x256xf32>
    %c1_126 = arith.constant 1 : index
    %c0_127 = arith.constant 0 : index
    %c0_128 = arith.constant 0 : index
    %147 = vector.load %arg3[%c1_126, %c0_127, %c0_128] : memref<9x8x12xf32, #tpu.memory_space<vmem>>, vector<1x8x12xf32>
    %148 = vector.shape_cast %147 : vector<1x8x12xf32> to vector<8x12xf32>
    %cst_129 = arith.constant dense<0.000000e+00> : vector<8x256xf32>
    %149 = tpu.matmul %148, %146, %cst_129 {dimension_numbers = #tpu.dot_dimension_numbers<[1], [0], [0], [1], [0, 0, 1, 1], [], []>} : vector<8x12xf32>, vector<12x256xf32>, vector<8x256xf32> -> vector<8x256xf32>
    %150 = arith.addf %144, %149 : vector<8x256xf32>
    %c0_130 = arith.constant 0 : index
    %c0_131 = arith.constant 0 : index
    %c532 = arith.constant 532 : index
    %151 = vector.load %arg2[%c0_130, %c0_131, %c532] : memref<1x12x1280xf32, #tpu.memory_space<vmem>>, vector<1x12x256xf32>
    %152 = vector.shape_cast %151 : vector<1x12x256xf32> to vector<12x256xf32>
    %c2_132 = arith.constant 2 : index
    %c0_133 = arith.constant 0 : index
    %c0_134 = arith.constant 0 : index
    %153 = vector.load %arg3[%c2_132, %c0_133, %c0_134] : memref<9x8x12xf32, #tpu.memory_space<vmem>>, vector<1x8x12xf32>
    %154 = vector.shape_cast %153 : vector<1x8x12xf32> to vector<8x12xf32>
    %cst_135 = arith.constant dense<0.000000e+00> : vector<8x256xf32>
    %155 = tpu.matmul %154, %152, %cst_135 {dimension_numbers = #tpu.dot_dimension_numbers<[1], [0], [0], [1], [0, 0, 1, 1], [], []>} : vector<8x12xf32>, vector<12x256xf32>, vector<8x256xf32> -> vector<8x256xf32>
    %156 = arith.addf %150, %155 : vector<8x256xf32>
    %c0_136 = arith.constant 0 : index
    %c0_137 = arith.constant 0 : index
    %c612 = arith.constant 612 : index
    %157 = vector.load %arg2[%c0_136, %c0_137, %c612] : memref<1x12x1280xf32, #tpu.memory_space<vmem>>, vector<1x12x256xf32>
    %158 = vector.shape_cast %157 : vector<1x12x256xf32> to vector<12x256xf32>
    %c3_138 = arith.constant 3 : index
    %c0_139 = arith.constant 0 : index
    %c0_140 = arith.constant 0 : index
    %159 = vector.load %arg3[%c3_138, %c0_139, %c0_140] : memref<9x8x12xf32, #tpu.memory_space<vmem>>, vector<1x8x12xf32>
    %160 = vector.shape_cast %159 : vector<1x8x12xf32> to vector<8x12xf32>
    %cst_141 = arith.constant dense<0.000000e+00> : vector<8x256xf32>
    %161 = tpu.matmul %160, %158, %cst_141 {dimension_numbers = #tpu.dot_dimension_numbers<[1], [0], [0], [1], [0, 0, 1, 1], [], []>} : vector<8x12xf32>, vector<12x256xf32>, vector<8x256xf32> -> vector<8x256xf32>
    %162 = arith.addf %156, %161 : vector<8x256xf32>
    %c0_142 = arith.constant 0 : index
    %c0_143 = arith.constant 0 : index
    %c622 = arith.constant 622 : index
    %163 = vector.load %arg2[%c0_142, %c0_143, %c622] : memref<1x12x1280xf32, #tpu.memory_space<vmem>>, vector<1x12x256xf32>
    %164 = vector.shape_cast %163 : vector<1x12x256xf32> to vector<12x256xf32>
    %c4_144 = arith.constant 4 : index
    %c0_145 = arith.constant 0 : index
    %c0_146 = arith.constant 0 : index
    %165 = vector.load %arg3[%c4_144, %c0_145, %c0_146] : memref<9x8x12xf32, #tpu.memory_space<vmem>>, vector<1x8x12xf32>
    %166 = vector.shape_cast %165 : vector<1x8x12xf32> to vector<8x12xf32>
    %cst_147 = arith.constant dense<0.000000e+00> : vector<8x256xf32>
    %167 = tpu.matmul %166, %164, %cst_147 {dimension_numbers = #tpu.dot_dimension_numbers<[1], [0], [0], [1], [0, 0, 1, 1], [], []>} : vector<8x12xf32>, vector<12x256xf32>, vector<8x256xf32> -> vector<8x256xf32>
    %168 = arith.addf %162, %167 : vector<8x256xf32>
    %c0_148 = arith.constant 0 : index
    %c0_149 = arith.constant 0 : index
    %c632 = arith.constant 632 : index
    %169 = vector.load %arg2[%c0_148, %c0_149, %c632] : memref<1x12x1280xf32, #tpu.memory_space<vmem>>, vector<1x12x256xf32>
    %170 = vector.shape_cast %169 : vector<1x12x256xf32> to vector<12x256xf32>
    %c5_150 = arith.constant 5 : index
    %c0_151 = arith.constant 0 : index
    %c0_152 = arith.constant 0 : index
    %171 = vector.load %arg3[%c5_150, %c0_151, %c0_152] : memref<9x8x12xf32, #tpu.memory_space<vmem>>, vector<1x8x12xf32>
    %172 = vector.shape_cast %171 : vector<1x8x12xf32> to vector<8x12xf32>
    %cst_153 = arith.constant dense<0.000000e+00> : vector<8x256xf32>
    %173 = tpu.matmul %172, %170, %cst_153 {dimension_numbers = #tpu.dot_dimension_numbers<[1], [0], [0], [1], [0, 0, 1, 1], [], []>} : vector<8x12xf32>, vector<12x256xf32>, vector<8x256xf32> -> vector<8x256xf32>
    %174 = arith.addf %168, %173 : vector<8x256xf32>
    %c0_154 = arith.constant 0 : index
    %c0_155 = arith.constant 0 : index
    %c712 = arith.constant 712 : index
    %175 = vector.load %arg2[%c0_154, %c0_155, %c712] : memref<1x12x1280xf32, #tpu.memory_space<vmem>>, vector<1x12x256xf32>
    %176 = vector.shape_cast %175 : vector<1x12x256xf32> to vector<12x256xf32>
    %c6_156 = arith.constant 6 : index
    %c0_157 = arith.constant 0 : index
    %c0_158 = arith.constant 0 : index
    %177 = vector.load %arg3[%c6_156, %c0_157, %c0_158] : memref<9x8x12xf32, #tpu.memory_space<vmem>>, vector<1x8x12xf32>
    %178 = vector.shape_cast %177 : vector<1x8x12xf32> to vector<8x12xf32>
    %cst_159 = arith.constant dense<0.000000e+00> : vector<8x256xf32>
    %179 = tpu.matmul %178, %176, %cst_159 {dimension_numbers = #tpu.dot_dimension_numbers<[1], [0], [0], [1], [0, 0, 1, 1], [], []>} : vector<8x12xf32>, vector<12x256xf32>, vector<8x256xf32> -> vector<8x256xf32>
    %180 = arith.addf %174, %179 : vector<8x256xf32>
    %c0_160 = arith.constant 0 : index
    %c0_161 = arith.constant 0 : index
    %c722 = arith.constant 722 : index
    %181 = vector.load %arg2[%c0_160, %c0_161, %c722] : memref<1x12x1280xf32, #tpu.memory_space<vmem>>, vector<1x12x256xf32>
    %182 = vector.shape_cast %181 : vector<1x12x256xf32> to vector<12x256xf32>
    %c7_162 = arith.constant 7 : index
    %c0_163 = arith.constant 0 : index
    %c0_164 = arith.constant 0 : index
    %183 = vector.load %arg3[%c7_162, %c0_163, %c0_164] : memref<9x8x12xf32, #tpu.memory_space<vmem>>, vector<1x8x12xf32>
    %184 = vector.shape_cast %183 : vector<1x8x12xf32> to vector<8x12xf32>
    %cst_165 = arith.constant dense<0.000000e+00> : vector<8x256xf32>
    %185 = tpu.matmul %184, %182, %cst_165 {dimension_numbers = #tpu.dot_dimension_numbers<[1], [0], [0], [1], [0, 0, 1, 1], [], []>} : vector<8x12xf32>, vector<12x256xf32>, vector<8x256xf32> -> vector<8x256xf32>
    %186 = arith.addf %180, %185 : vector<8x256xf32>
    %c0_166 = arith.constant 0 : index
    %c0_167 = arith.constant 0 : index
    %c732 = arith.constant 732 : index
    %187 = vector.load %arg2[%c0_166, %c0_167, %c732] : memref<1x12x1280xf32, #tpu.memory_space<vmem>>, vector<1x12x256xf32>
    %188 = vector.shape_cast %187 : vector<1x12x256xf32> to vector<12x256xf32>
    %c8_168 = arith.constant 8 : index
    %c0_169 = arith.constant 0 : index
    %c0_170 = arith.constant 0 : index
    %189 = vector.load %arg3[%c8_168, %c0_169, %c0_170] : memref<9x8x12xf32, #tpu.memory_space<vmem>>, vector<1x8x12xf32>
    %190 = vector.shape_cast %189 : vector<1x8x12xf32> to vector<8x12xf32>
    %cst_171 = arith.constant dense<0.000000e+00> : vector<8x256xf32>
    %191 = tpu.matmul %190, %188, %cst_171 {dimension_numbers = #tpu.dot_dimension_numbers<[1], [0], [0], [1], [0, 0, 1, 1], [], []>} : vector<8x12xf32>, vector<12x256xf32>, vector<8x256xf32> -> vector<8x256xf32>
    %192 = arith.addf %186, %191 : vector<8x256xf32>
    %c0_172 = arith.constant 0 : index
    %c512_173 = arith.constant 512 : index
    %193 = vector.load %arg6[%c0_172, %c512_173] : memref<1x1024xf32, #tpu.memory_space<vmem>>, vector<1x256xf32>
    %194 = vector.broadcast %193 : vector<1x256xf32> to vector<8x256xf32>
    %195 = arith.mulf %192, %194 : vector<8x256xf32>
    %cst_174 = arith.constant dense<0.000000e+00> : vector<8xf32>
    %196 = vector.multi_reduction <add>, %195, %cst_174 [1] : vector<8x256xf32> to vector<8xf32>
    %197 = vector.shape_cast %196 : vector<8xf32> to vector<8x1xf32>
    %198 = arith.addf %130, %197 : vector<8x1xf32>
    %199 = arith.mulf %195, %195 : vector<8x256xf32>
    %cst_175 = arith.constant dense<0.000000e+00> : vector<8xf32>
    %200 = vector.multi_reduction <add>, %199, %cst_175 [1] : vector<8x256xf32> to vector<8xf32>
    %201 = vector.shape_cast %200 : vector<8xf32> to vector<8x1xf32>
    %202 = arith.addf %134, %201 : vector<8x1xf32>
    %c0_176 = arith.constant 0 : index
    %c0_177 = arith.constant 0 : index
    %c512_178 = arith.constant 512 : index
    %203 = vector.load %arg7[%c0_176, %c0_177, %c512_178] : memref<1x8x1024xf32, #tpu.memory_space<vmem>>, vector<1x8x256xf32>
    %204 = vector.shape_cast %203 : vector<1x8x256xf32> to vector<8x256xf32>
    %205 = vector.shape_cast %192 : vector<8x256xf32> to vector<1x8x256xf32>
    tpu.vector_store %arg7[%c0_176, %c0_177, %c512_178], %205 {strides = array<i32>} : memref<1x8x1024xf32, #tpu.memory_space<vmem>>, vector<1x8x256xf32>,
    %cst_179 = arith.constant 0.000000e+00 : f32
    %206 = vector.broadcast %cst_179 : f32 to vector<8x256xf32>
    %c0_180 = arith.constant 0 : index
    %c0_181 = arith.constant 0 : index
    %c768 = arith.constant 768 : index
    %207 = vector.load %arg2[%c0_180, %c0_181, %c768] : memref<1x12x1280xf32, #tpu.memory_space<vmem>>, vector<1x12x256xf32>
    %208 = vector.shape_cast %207 : vector<1x12x256xf32> to vector<12x256xf32>
    %c0_182 = arith.constant 0 : index
    %c0_183 = arith.constant 0 : index
    %c0_184 = arith.constant 0 : index
    %209 = vector.load %arg3[%c0_182, %c0_183, %c0_184] : memref<9x8x12xf32, #tpu.memory_space<vmem>>, vector<1x8x12xf32>
    %210 = vector.shape_cast %209 : vector<1x8x12xf32> to vector<8x12xf32>
    %cst_185 = arith.constant dense<0.000000e+00> : vector<8x256xf32>
    %211 = tpu.matmul %210, %208, %cst_185 {dimension_numbers = #tpu.dot_dimension_numbers<[1], [0], [0], [1], [0, 0, 1, 1], [], []>} : vector<8x12xf32>, vector<12x256xf32>, vector<8x256xf32> -> vector<8x256xf32>
    %212 = arith.addf %206, %211 : vector<8x256xf32>
    %c0_186 = arith.constant 0 : index
    %c0_187 = arith.constant 0 : index
    %c778 = arith.constant 778 : index
    %213 = vector.load %arg2[%c0_186, %c0_187, %c778] : memref<1x12x1280xf32, #tpu.memory_space<vmem>>, vector<1x12x256xf32>
    %214 = vector.shape_cast %213 : vector<1x12x256xf32> to vector<12x256xf32>
    %c1_188 = arith.constant 1 : index
    %c0_189 = arith.constant 0 : index
    %c0_190 = arith.constant 0 : index
    %215 = vector.load %arg3[%c1_188, %c0_189, %c0_190] : memref<9x8x12xf32, #tpu.memory_space<vmem>>, vector<1x8x12xf32>
    %216 = vector.shape_cast %215 : vector<1x8x12xf32> to vector<8x12xf32>
    %cst_191 = arith.constant dense<0.000000e+00> : vector<8x256xf32>
    %217 = tpu.matmul %216, %214, %cst_191 {dimension_numbers = #tpu.dot_dimension_numbers<[1], [0], [0], [1], [0, 0, 1, 1], [], []>} : vector<8x12xf32>, vector<12x256xf32>, vector<8x256xf32> -> vector<8x256xf32>
    %218 = arith.addf %212, %217 : vector<8x256xf32>
    %c0_192 = arith.constant 0 : index
    %c0_193 = arith.constant 0 : index
    %c788 = arith.constant 788 : index
    %219 = vector.load %arg2[%c0_192, %c0_193, %c788] : memref<1x12x1280xf32, #tpu.memory_space<vmem>>, vector<1x12x256xf32>
    %220 = vector.shape_cast %219 : vector<1x12x256xf32> to vector<12x256xf32>
    %c2_194 = arith.constant 2 : index
    %c0_195 = arith.constant 0 : index
    %c0_196 = arith.constant 0 : index
    %221 = vector.load %arg3[%c2_194, %c0_195, %c0_196] : memref<9x8x12xf32, #tpu.memory_space<vmem>>, vector<1x8x12xf32>
    %222 = vector.shape_cast %221 : vector<1x8x12xf32> to vector<8x12xf32>
    %cst_197 = arith.constant dense<0.000000e+00> : vector<8x256xf32>
    %223 = tpu.matmul %222, %220, %cst_197 {dimension_numbers = #tpu.dot_dimension_numbers<[1], [0], [0], [1], [0, 0, 1, 1], [], []>} : vector<8x12xf32>, vector<12x256xf32>, vector<8x256xf32> -> vector<8x256xf32>
    %224 = arith.addf %218, %223 : vector<8x256xf32>
    %c0_198 = arith.constant 0 : index
    %c0_199 = arith.constant 0 : index
    %c868 = arith.constant 868 : index
    %225 = vector.load %arg2[%c0_198, %c0_199, %c868] : memref<1x12x1280xf32, #tpu.memory_space<vmem>>, vector<1x12x256xf32>
    %226 = vector.shape_cast %225 : vector<1x12x256xf32> to vector<12x256xf32>
    %c3_200 = arith.constant 3 : index
    %c0_201 = arith.constant 0 : index
    %c0_202 = arith.constant 0 : index
    %227 = vector.load %arg3[%c3_200, %c0_201, %c0_202] : memref<9x8x12xf32, #tpu.memory_space<vmem>>, vector<1x8x12xf32>
    %228 = vector.shape_cast %227 : vector<1x8x12xf32> to vector<8x12xf32>
    %cst_203 = arith.constant dense<0.000000e+00> : vector<8x256xf32>
    %229 = tpu.matmul %228, %226, %cst_203 {dimension_numbers = #tpu.dot_dimension_numbers<[1], [0], [0], [1], [0, 0, 1, 1], [], []>} : vector<8x12xf32>, vector<12x256xf32>, vector<8x256xf32> -> vector<8x256xf32>
    %230 = arith.addf %224, %229 : vector<8x256xf32>
    %c0_204 = arith.constant 0 : index
    %c0_205 = arith.constant 0 : index
    %c878 = arith.constant 878 : index
    %231 = vector.load %arg2[%c0_204, %c0_205, %c878] : memref<1x12x1280xf32, #tpu.memory_space<vmem>>, vector<1x12x256xf32>
    %232 = vector.shape_cast %231 : vector<1x12x256xf32> to vector<12x256xf32>
    %c4_206 = arith.constant 4 : index
    %c0_207 = arith.constant 0 : index
    %c0_208 = arith.constant 0 : index
    %233 = vector.load %arg3[%c4_206, %c0_207, %c0_208] : memref<9x8x12xf32, #tpu.memory_space<vmem>>, vector<1x8x12xf32>
    %234 = vector.shape_cast %233 : vector<1x8x12xf32> to vector<8x12xf32>
    %cst_209 = arith.constant dense<0.000000e+00> : vector<8x256xf32>
    %235 = tpu.matmul %234, %232, %cst_209 {dimension_numbers = #tpu.dot_dimension_numbers<[1], [0], [0], [1], [0, 0, 1, 1], [], []>} : vector<8x12xf32>, vector<12x256xf32>, vector<8x256xf32> -> vector<8x256xf32>
    %236 = arith.addf %230, %235 : vector<8x256xf32>
    %c0_210 = arith.constant 0 : index
    %c0_211 = arith.constant 0 : index
    %c888 = arith.constant 888 : index
    %237 = vector.load %arg2[%c0_210, %c0_211, %c888] : memref<1x12x1280xf32, #tpu.memory_space<vmem>>, vector<1x12x256xf32>
    %238 = vector.shape_cast %237 : vector<1x12x256xf32> to vector<12x256xf32>
    %c5_212 = arith.constant 5 : index
    %c0_213 = arith.constant 0 : index
    %c0_214 = arith.constant 0 : index
    %239 = vector.load %arg3[%c5_212, %c0_213, %c0_214] : memref<9x8x12xf32, #tpu.memory_space<vmem>>, vector<1x8x12xf32>
    %240 = vector.shape_cast %239 : vector<1x8x12xf32> to vector<8x12xf32>
    %cst_215 = arith.constant dense<0.000000e+00> : vector<8x256xf32>
    %241 = tpu.matmul %240, %238, %cst_215 {dimension_numbers = #tpu.dot_dimension_numbers<[1], [0], [0], [1], [0, 0, 1, 1], [], []>} : vector<8x12xf32>, vector<12x256xf32>, vector<8x256xf32> -> vector<8x256xf32>
    %242 = arith.addf %236, %241 : vector<8x256xf32>
    %c0_216 = arith.constant 0 : index
    %c0_217 = arith.constant 0 : index
    %c968 = arith.constant 968 : index
    %243 = vector.load %arg2[%c0_216, %c0_217, %c968] : memref<1x12x1280xf32, #tpu.memory_space<vmem>>, vector<1x12x256xf32>
    %244 = vector.shape_cast %243 : vector<1x12x256xf32> to vector<12x256xf32>
    %c6_218 = arith.constant 6 : index
    %c0_219 = arith.constant 0 : index
    %c0_220 = arith.constant 0 : index
    %245 = vector.load %arg3[%c6_218, %c0_219, %c0_220] : memref<9x8x12xf32, #tpu.memory_space<vmem>>, vector<1x8x12xf32>
    %246 = vector.shape_cast %245 : vector<1x8x12xf32> to vector<8x12xf32>
    %cst_221 = arith.constant dense<0.000000e+00> : vector<8x256xf32>
    %247 = tpu.matmul %246, %244, %cst_221 {dimension_numbers = #tpu.dot_dimension_numbers<[1], [0], [0], [1], [0, 0, 1, 1], [], []>} : vector<8x12xf32>, vector<12x256xf32>, vector<8x256xf32> -> vector<8x256xf32>
    %248 = arith.addf %242, %247 : vector<8x256xf32>
    %c0_222 = arith.constant 0 : index
    %c0_223 = arith.constant 0 : index
    %c978 = arith.constant 978 : index
    %249 = vector.load %arg2[%c0_222, %c0_223, %c978] : memref<1x12x1280xf32, #tpu.memory_space<vmem>>, vector<1x12x256xf32>
    %250 = vector.shape_cast %249 : vector<1x12x256xf32> to vector<12x256xf32>
    %c7_224 = arith.constant 7 : index
    %c0_225 = arith.constant 0 : index
    %c0_226 = arith.constant 0 : index
    %251 = vector.load %arg3[%c7_224, %c0_225, %c0_226] : memref<9x8x12xf32, #tpu.memory_space<vmem>>, vector<1x8x12xf32>
    %252 = vector.shape_cast %251 : vector<1x8x12xf32> to vector<8x12xf32>
    %cst_227 = arith.constant dense<0.000000e+00> : vector<8x256xf32>
    %253 = tpu.matmul %252, %250, %cst_227 {dimension_numbers = #tpu.dot_dimension_numbers<[1], [0], [0], [1], [0, 0, 1, 1], [], []>} : vector<8x12xf32>, vector<12x256xf32>, vector<8x256xf32> -> vector<8x256xf32>
    %254 = arith.addf %248, %253 : vector<8x256xf32>
    %c0_228 = arith.constant 0 : index
    %c0_229 = arith.constant 0 : index
    %c988 = arith.constant 988 : index
    %255 = vector.load %arg2[%c0_228, %c0_229, %c988] : memref<1x12x1280xf32, #tpu.memory_space<vmem>>, vector<1x12x256xf32>
    %256 = vector.shape_cast %255 : vector<1x12x256xf32> to vector<12x256xf32>
    %c8_230 = arith.constant 8 : index
    %c0_231 = arith.constant 0 : index
    %c0_232 = arith.constant 0 : index
    %257 = vector.load %arg3[%c8_230, %c0_231, %c0_232] : memref<9x8x12xf32, #tpu.memory_space<vmem>>, vector<1x8x12xf32>
    %258 = vector.shape_cast %257 : vector<1x8x12xf32> to vector<8x12xf32>
    %cst_233 = arith.constant dense<0.000000e+00> : vector<8x256xf32>
    %259 = tpu.matmul %258, %256, %cst_233 {dimension_numbers = #tpu.dot_dimension_numbers<[1], [0], [0], [1], [0, 0, 1, 1], [], []>} : vector<8x12xf32>, vector<12x256xf32>, vector<8x256xf32> -> vector<8x256xf32>
    %260 = arith.addf %254, %259 : vector<8x256xf32>
    %c0_234 = arith.constant 0 : index
    %c768_235 = arith.constant 768 : index
    %261 = vector.load %arg6[%c0_234, %c768_235] : memref<1x1024xf32, #tpu.memory_space<vmem>>, vector<1x256xf32>
    %262 = vector.broadcast %261 : vector<1x256xf32> to vector<8x256xf32>
    %263 = arith.mulf %260, %262 : vector<8x256xf32>
    %cst_236 = arith.constant dense<0.000000e+00> : vector<8xf32>
    %264 = vector.multi_reduction <add>, %263, %cst_236 [1] : vector<8x256xf32> to vector<8xf32>
    %265 = vector.shape_cast %264 : vector<8xf32> to vector<8x1xf32>
    %266 = arith.addf %198, %265 : vector<8x1xf32>
    %267 = arith.mulf %263, %263 : vector<8x256xf32>
    %cst_237 = arith.constant dense<0.000000e+00> : vector<8xf32>
    %268 = vector.multi_reduction <add>, %267, %cst_237 [1] : vector<8x256xf32> to vector<8xf32>
    %269 = vector.shape_cast %268 : vector<8xf32> to vector<8x1xf32>
    %270 = arith.addf %202, %269 : vector<8x1xf32>
    %c0_238 = arith.constant 0 : index
    %c0_239 = arith.constant 0 : index
    %c768_240 = arith.constant 768 : index
    %271 = vector.load %arg7[%c0_238, %c0_239, %c768_240] : memref<1x8x1024xf32, #tpu.memory_space<vmem>>, vector<1x8x256xf32>
    %272 = vector.shape_cast %271 : vector<1x8x256xf32> to vector<8x256xf32>
    %273 = vector.shape_cast %260 : vector<8x256xf32> to vector<1x8x256xf32>
    tpu.vector_store %arg7[%c0_238, %c0_239, %c768_240], %273 {strides = array<i32>} : memref<1x8x1024xf32, #tpu.memory_space<vmem>>, vector<1x8x256xf32>,
    %cst_241 = arith.constant 0.001953125 : f32
    %274 = vector.broadcast %cst_241 : f32 to vector<8x1xf32>
    %275 = arith.mulf %266, %274 : vector<8x1xf32>
    %cst_242 = arith.constant 0.001953125 : f32
    %276 = vector.broadcast %cst_242 : f32 to vector<8x1xf32>
    %277 = arith.mulf %270, %276 : vector<8x1xf32>
    %278 = arith.mulf %275, %275 : vector<8x1xf32>
    %279 = arith.subf %277, %278 : vector<8x1xf32>
    %cst_243 = arith.constant 0.000000e+00 : f32
    %280 = vector.broadcast %cst_243 : f32 to vector<8x1xf32>
    %281 = arith.maximumf %279, %280 : vector<8x1xf32>
    %cst_244 = arith.constant 9.99999974E-6 : f32
    %282 = vector.broadcast %cst_244 : f32 to vector<8x1xf32>
    %283 = arith.addf %281, %282 : vector<8x1xf32>
    %284 = math.rsqrt %283 : vector<8x1xf32>
    %c0_245 = arith.constant 0 : index
    %c0_246 = arith.constant 0 : index
    %c0_247 = arith.constant 0 : index
    %285 = vector.load %arg7[%c0_245, %c0_246, %c0_247] : memref<1x8x1024xf32, #tpu.memory_space<vmem>>, vector<1x8x256xf32>
    %286 = vector.shape_cast %285 : vector<1x8x256xf32> to vector<8x256xf32>
    %287 = vector.broadcast %275 : vector<8x1xf32> to vector<8x256xf32>
    %288 = arith.subf %286, %287 : vector<8x256xf32>
    %289 = vector.broadcast %284 : vector<8x1xf32> to vector<8x256xf32>
    %290 = arith.mulf %288, %289 : vector<8x256xf32>
    %c0_248 = arith.constant 0 : index
    %c0_249 = arith.constant 0 : index
    %291 = vector.load %arg4[%c0_248, %c0_249] : memref<1x1024xf32, #tpu.memory_space<vmem>>, vector<1x256xf32>
    %292 = vector.broadcast %291 : vector<1x256xf32> to vector<8x256xf32>
    %293 = arith.mulf %290, %292 : vector<8x256xf32>
    %c0_250 = arith.constant 0 : index
    %c0_251 = arith.constant 0 : index
    %294 = vector.load %arg5[%c0_250, %c0_251] : memref<1x1024xf32, #tpu.memory_space<vmem>>, vector<1x256xf32>
    %295 = vector.broadcast %294 : vector<1x256xf32> to vector<8x256xf32>
    %296 = arith.addf %293, %295 : vector<8x256xf32>
    %cst_252 = arith.constant 0.000000e+00 : f32
    %297 = vector.broadcast %cst_252 : f32 to vector<8x256xf32>
    %298 = arith.cmpf oge, %296, %297 : vector<8x256xf32>
    %cst_253 = arith.constant 1.000000e-01 : f32
    %299 = vector.broadcast %cst_253 : f32 to vector<8x256xf32>
    %300 = arith.mulf %299, %296 : vector<8x256xf32>
    %301 = arith.select %298, %296, %300 : vector<8x256xi1>, vector<8x256xf32>
    %c0_254 = arith.constant 0 : index
    %c0_255 = arith.constant 0 : index
    %c0_256 = arith.constant 0 : index
    %302 = vector.load %arg7[%c0_254, %c0_255, %c0_256] : memref<1x8x1024xf32, #tpu.memory_space<vmem>>, vector<1x8x256xf32>
    %303 = vector.shape_cast %302 : vector<1x8x256xf32> to vector<8x256xf32>
    %304 = vector.shape_cast %301 : vector<8x256xf32> to vector<1x8x256xf32>
    tpu.vector_store %arg7[%c0_254, %c0_255, %c0_256], %304 {strides = array<i32>} : memref<1x8x1024xf32, #tpu.memory_space<vmem>>, vector<1x8x256xf32>,
    %c0_257 = arith.constant 0 : index
    %c0_258 = arith.constant 0 : index
    %c256_259 = arith.constant 256 : index
    %305 = vector.load %arg7[%c0_257, %c0_258, %c256_259] : memref<1x8x1024xf32, #tpu.memory_space<vmem>>, vector<1x8x256xf32>
    %306 = vector.shape_cast %305 : vector<1x8x256xf32> to vector<8x256xf32>
    %307 = vector.broadcast %275 : vector<8x1xf32> to vector<8x256xf32>
    %308 = arith.subf %306, %307 : vector<8x256xf32>
    %309 = vector.broadcast %284 : vector<8x1xf32> to vector<8x256xf32>
    %310 = arith.mulf %308, %309 : vector<8x256xf32>
    %c0_260 = arith.constant 0 : index
    %c256_261 = arith.constant 256 : index
    %311 = vector.load %arg4[%c0_260, %c256_261] : memref<1x1024xf32, #tpu.memory_space<vmem>>, vector<1x256xf32>
    %312 = vector.broadcast %311 : vector<1x256xf32> to vector<8x256xf32>
    %313 = arith.mulf %310, %312 : vector<8x256xf32>
    %c0_262 = arith.constant 0 : index
    %c256_263 = arith.constant 256 : index
    %314 = vector.load %arg5[%c0_262, %c256_263] : memref<1x1024xf32, #tpu.memory_space<vmem>>, vector<1x256xf32>
    %315 = vector.broadcast %314 : vector<1x256xf32> to vector<8x256xf32>
    %316 = arith.addf %313, %315 : vector<8x256xf32>
    %cst_264 = arith.constant 0.000000e+00 : f32
    %317 = vector.broadcast %cst_264 : f32 to vector<8x256xf32>
    %318 = arith.cmpf oge, %316, %317 : vector<8x256xf32>
    %cst_265 = arith.constant 1.000000e-01 : f32
    %319 = vector.broadcast %cst_265 : f32 to vector<8x256xf32>
    %320 = arith.mulf %319, %316 : vector<8x256xf32>
    %321 = arith.select %318, %316, %320 : vector<8x256xi1>, vector<8x256xf32>
    %c0_266 = arith.constant 0 : index
    %c0_267 = arith.constant 0 : index
    %c256_268 = arith.constant 256 : index
    %322 = vector.load %arg7[%c0_266, %c0_267, %c256_268] : memref<1x8x1024xf32, #tpu.memory_space<vmem>>, vector<1x8x256xf32>
    %323 = vector.shape_cast %322 : vector<1x8x256xf32> to vector<8x256xf32>
    %324 = vector.shape_cast %321 : vector<8x256xf32> to vector<1x8x256xf32>
    tpu.vector_store %arg7[%c0_266, %c0_267, %c256_268], %324 {strides = array<i32>} : memref<1x8x1024xf32, #tpu.memory_space<vmem>>, vector<1x8x256xf32>,
    %c0_269 = arith.constant 0 : index
    %c0_270 = arith.constant 0 : index
    %c512_271 = arith.constant 512 : index
    %325 = vector.load %arg7[%c0_269, %c0_270, %c512_271] : memref<1x8x1024xf32, #tpu.memory_space<vmem>>, vector<1x8x256xf32>
    %326 = vector.shape_cast %325 : vector<1x8x256xf32> to vector<8x256xf32>
    %327 = vector.broadcast %275 : vector<8x1xf32> to vector<8x256xf32>
    %328 = arith.subf %326, %327 : vector<8x256xf32>
    %329 = vector.broadcast %284 : vector<8x1xf32> to vector<8x256xf32>
    %330 = arith.mulf %328, %329 : vector<8x256xf32>
    %c0_272 = arith.constant 0 : index
    %c512_273 = arith.constant 512 : index
    %331 = vector.load %arg4[%c0_272, %c512_273] : memref<1x1024xf32, #tpu.memory_space<vmem>>, vector<1x256xf32>
    %332 = vector.broadcast %331 : vector<1x256xf32> to vector<8x256xf32>
    %333 = arith.mulf %330, %332 : vector<8x256xf32>
    %c0_274 = arith.constant 0 : index
    %c512_275 = arith.constant 512 : index
    %334 = vector.load %arg5[%c0_274, %c512_275] : memref<1x1024xf32, #tpu.memory_space<vmem>>, vector<1x256xf32>
    %335 = vector.broadcast %334 : vector<1x256xf32> to vector<8x256xf32>
    %336 = arith.addf %333, %335 : vector<8x256xf32>
    %cst_276 = arith.constant 0.000000e+00 : f32
    %337 = vector.broadcast %cst_276 : f32 to vector<8x256xf32>
    %338 = arith.cmpf oge, %336, %337 : vector<8x256xf32>
    %cst_277 = arith.constant 1.000000e-01 : f32
    %339 = vector.broadcast %cst_277 : f32 to vector<8x256xf32>
    %340 = arith.mulf %339, %336 : vector<8x256xf32>
    %341 = arith.select %338, %336, %340 : vector<8x256xi1>, vector<8x256xf32>
    %c0_278 = arith.constant 0 : index
    %c0_279 = arith.constant 0 : index
    %c512_280 = arith.constant 512 : index
    %342 = vector.load %arg7[%c0_278, %c0_279, %c512_280] : memref<1x8x1024xf32, #tpu.memory_space<vmem>>, vector<1x8x256xf32>
    %343 = vector.shape_cast %342 : vector<1x8x256xf32> to vector<8x256xf32>
    %344 = vector.shape_cast %341 : vector<8x256xf32> to vector<1x8x256xf32>
    tpu.vector_store %arg7[%c0_278, %c0_279, %c512_280], %344 {strides = array<i32>} : memref<1x8x1024xf32, #tpu.memory_space<vmem>>, vector<1x8x256xf32>,
    %c0_281 = arith.constant 0 : index
    %c0_282 = arith.constant 0 : index
    %c768_283 = arith.constant 768 : index
    %345 = vector.load %arg7[%c0_281, %c0_282, %c768_283] : memref<1x8x1024xf32, #tpu.memory_space<vmem>>, vector<1x8x256xf32>
    %346 = vector.shape_cast %345 : vector<1x8x256xf32> to vector<8x256xf32>
    %347 = vector.broadcast %275 : vector<8x1xf32> to vector<8x256xf32>
    %348 = arith.subf %346, %347 : vector<8x256xf32>
    %349 = vector.broadcast %284 : vector<8x1xf32> to vector<8x256xf32>
    %350 = arith.mulf %348, %349 : vector<8x256xf32>
    %c0_284 = arith.constant 0 : index
    %c768_285 = arith.constant 768 : index
    %351 = vector.load %arg4[%c0_284, %c768_285] : memref<1x1024xf32, #tpu.memory_space<vmem>>, vector<1x256xf32>
    %352 = vector.broadcast %351 : vector<1x256xf32> to vector<8x256xf32>
    %353 = arith.mulf %350, %352 : vector<8x256xf32>
    %c0_286 = arith.constant 0 : index
    %c768_287 = arith.constant 768 : index
    %354 = vector.load %arg5[%c0_286, %c768_287] : memref<1x1024xf32, #tpu.memory_space<vmem>>, vector<1x256xf32>
    %355 = vector.broadcast %354 : vector<1x256xf32> to vector<8x256xf32>
    %356 = arith.addf %353, %355 : vector<8x256xf32>
    %cst_288 = arith.constant 0.000000e+00 : f32
    %357 = vector.broadcast %cst_288 : f32 to vector<8x256xf32>
    %358 = arith.cmpf oge, %356, %357 : vector<8x256xf32>
    %cst_289 = arith.constant 1.000000e-01 : f32
    %359 = vector.broadcast %cst_289 : f32 to vector<8x256xf32>
    %360 = arith.mulf %359, %356 : vector<8x256xf32>
    %361 = arith.select %358, %356, %360 : vector<8x256xi1>, vector<8x256xf32>
    %c0_290 = arith.constant 0 : index
    %c0_291 = arith.constant 0 : index
    %c768_292 = arith.constant 768 : index
    %362 = vector.load %arg7[%c0_290, %c0_291, %c768_292] : memref<1x8x1024xf32, #tpu.memory_space<vmem>>, vector<1x8x256xf32>
    %363 = vector.shape_cast %362 : vector<1x8x256xf32> to vector<8x256xf32>
    %364 = vector.shape_cast %361 : vector<8x256xf32> to vector<1x8x256xf32>
    tpu.vector_store %arg7[%c0_290, %c0_291, %c768_292], %364 {strides = array<i32>} : memref<1x8x1024xf32, #tpu.memory_space<vmem>>, vector<1x8x256xf32>,
    return
  }
  func.func @transform_0(%arg0: i32, %arg1: i32) -> (i32, i32, i32) {
    %c0_i32 = arith.constant 0 : i32
    %c0_i32_0 = arith.constant 0 : i32
    %c0_i32_1 = arith.constant 0 : i32
    return %arg0, %c0_i32, %c0_i32_0 : i32, i32, i32
  }
  func.func @transform_1(%arg0: i32, %arg1: i32) -> (i32, i32, i32) {
    %c0_i32 = arith.constant 0 : i32
    %c0_i32_0 = arith.constant 0 : i32
    %c0_i32_1 = arith.constant 0 : i32
    return %c0_i32, %arg1, %c0_i32_0 : i32, i32, i32
  }
  func.func @transform_2(%arg0: i32, %arg1: i32) -> (i32, i32) {
    %c0_i32 = arith.constant 0 : i32
    %c0_i32_0 = arith.constant 0 : i32
    %c0_i32_1 = arith.constant 0 : i32
    return %c0_i32, %c0_i32_0 : i32, i32
  }
  func.func @transform_3(%arg0: i32, %arg1: i32) -> (i32, i32) {
    %c0_i32 = arith.constant 0 : i32
    %c0_i32_0 = arith.constant 0 : i32
    %c0_i32_1 = arith.constant 0 : i32
    return %c0_i32, %c0_i32_0 : i32, i32
  }
  func.func @transform_4(%arg0: i32, %arg1: i32) -> (i32, i32) {
    %c0_i32 = arith.constant 0 : i32
    %c0_i32_0 = arith.constant 0 : i32
    %c0_i32_1 = arith.constant 0 : i32
    return %c0_i32, %c0_i32_0 : i32, i32
  }
  func.func @transform_5(%arg0: i32, %arg1: i32) -> (i32, i32, i32) {
    %c0_i32 = arith.constant 0 : i32
    %c0_i32_0 = arith.constant 0 : i32
    return %arg0, %arg1, %c0_i32 : i32, i32, i32
  }
}

</mosaic_0001>

<bundles_post_ra>
// kernel: tpu_custom_call.1
= control target key start
LH: loop header
LB: loop body
LE: loop exit
PB: predicated region body
PF: predicated region fallthrough
CT: control target
= control target key end

     0   :  { %10 = vsyncpa [#allocation3], 0  ;;  %s5560_s0 = inlined_call_operand.vmem [shape: f32[2,12,1280], index: 0, kind: input, shape index: {}]   ;;  %s5561_s1 = inlined_call_operand.vmem [shape: f32[9,8,12], index: 1, kind: input, shape index: {}]   ;;  %s5562_s2 = inlined_call_operand.vmem [shape: f32[1,1024], index: 2, kind: input, shape index: {}]   ;;  %s5563_s3 = inlined_call_operand.vmem [shape: f32[1,1024], index: 3, kind: input, shape index: {}]   ;;  %s5564_s4 = inlined_call_operand.vmem [shape: f32[1,1024], index: 4, kind: input, shape index: {}]   ;;  %s5565_s5 = inlined_call_operand.hbm [shape: f32[2,8,1024], index: 5, kind: output, shape index: {}]  }
   0x1   :  { %12 = vsyncpa [#allocation3 + $0x1], 0  ;;  %s4565_s18 = smov 0   ;;  %s4567_s19 = smov 0  }
   0x2   :  { %s4569_s20 = smov 0   ;;  %s4571_s21 = smov 0  }
   0x3   :  { %s4573_s22 = smov 0   ;;  %s4575_s23 = smov 0  }
   0x4 LB: > { %s4225_s24 = sadd.s32 4294967295, %s4523_s23   ;;  %s4226_s25 = sadd.s32 4294967294, %s4523_s23   ;;  %s4523_s23 = sphi %s4575_s23, %s18_s23   ;;  %s4519_s22 = sphi %s4573_s22, %s5572_s22   ;;  %s4515_s21 = sphi %s4571_s21, %s5571_s21   ;;  %s4511_s20 = sphi %s4569_s20, %s5570_s20   ;;  %s4507_s19 = sphi %s4567_s19, %s5569_s19   ;;  %s4503_s18 = sphi %s4565_s18, %s5568_s18  }
   0x5   : > { %s30_s26 = sadd.s32 1, %s4519_s22  ;;  %s154_s27 = sadd.s32 1, %s4511_s20 }
   0x6   : > { %p32_p0 = scmp.ge.s32.totalorder %s30_s26, 2  ;;  %p164_p1 = scmp.ne.s32.totalorder %s4511_s20, %s4507_s19 }
   0x7   : > { %p165_p2 = scmp.eq.s32.totalorder %s4225_s24, 1  ;;  %p170_p3 = scmp.ne.s32.totalorder %s4507_s19, %s4503_s18 }
   0x8   : > { %s5574_s26 = smov (%p32_p0, %s30_s26), 0  ;;  %p171_p5 = scmp.eq.s32.totalorder %s4226_s25, 1 }
   0x9   : > { %p4605_p4 = por %p165_p2, %p164_p1  ;;  %s149_s29 = ssub.s32 %s4519_s22, %s5574_s26 }
   0xa   : > { %p4230_p6 = scmp.ge.s32.totalorder %s4523_s23, 1  ;;  %p152_p7 = scmp.eq.s32.totalorder %s149_s29, 0 }
   0xb   : > { %p4612_p8 = por %p171_p5, %p170_p3  ;;  %p213_p9 = scmp.lt.s32.totalorder %s4523_s23, 3 }
   0xc   : > { %s4618_s6 = scalar_select %p152_p7, %s4511_s20, %s154_s27  }
   0xd   : > { %p214_p10 = pnand %p4230_p6, %p213_p9 }
   0xe   : > { %p245_p11 = scmp.lt.s32.totalorder (!%p214_p10), %s4515_s21, 1  ;;  %s4525_s12 = smov (!%p214_p10), 118  }
   0xf   : > { %217 = sbr.rel (%p214_p10) target bundleno = 917 (0x395), region = 40  ;;  %s4527_s13 = smov (!%p214_p10), 108  }
  0x10   : > { %s4528_s16 = smov (!%p214_p10), 28   ;;  %s4529_s17 = smov (!%p214_p10), 18  }
  0x11   : > { %s4530_s24 = smov (!%p214_p10), 8   ;;  %s4531_s25 = smov (!%p214_p10), 56  }
  0x12   : > { %s4532_s27 = smov (!%p214_p10), 46   ;;  %s4533_s29 = smov (!%p214_p10), 36  }
  0x13   : > { %s4378_s10 = sshll.u32 (!%p214_p10), %s4515_s21, 10 }
  0x14   : > { %s246_s7 = scalar_select %p245_p11, %s4515_s21, 1  ;;  %vm292_vm0 = vcmask 1043456   ;;  %v4526_v6 = vmov 0.0   ;;  %vm288_vm1 = vcmask 97280   ;;  %v4661_v7 = vld [vmem:[%s5561_s1] sm:$0xff]  ;;  %vm281_vm2 = vcmask 965632  }
  0x15   : > { %361 = vmatprep.mubr.f32.mxu0 %v4526_v6  ;;  %439 = vmatprep.mubr.f32.mxu1 %v4526_v6  ;;  %v4775_v27 = vld [vmem:[%s5561_s1 + $0x8] sm:$0xff]  ;;  %vm460_vm3 = vcmask 883712   ;;  %v4801_v36 = vld [vmem:[%s5561_s1 + $0x10] sm:$0xff]  ;;  %vm561_vm4 = vcmask 228352   ;;  %v4828_v48 = vld [vmem:[%s5561_s1 + $0x18] sm:$0xff]  ;;  %vm662_vm5 = vcmask 146432  }
  0x16   : > { %s4379_s8 = smul.u32 160, %s246_s7  ;;  %v4853_v61 = vld [vmem:[%s5561_s1 + $0x20] sm:$0xff]  ;;  %vm763_vm6 = vcmask 64512   ;;  %vm876_vm7 = vcmask 457728   ;;  %vm977_vm8 = vcmask 375808   ;;  %vm1078_vm9 = vcmask 293888  }
  0x18   : > { %s4625_s11 = scalar_lea.vmem %s5560_s0, %s4379_s8  ;;  %s242_s8 = sand.u32 1, %s4507_s19  }
  0x19   : > { %v4628_v0 = vld [vmem:[%s4625_s11 + $0x10] sm:$0xff]  ;;  %v254_v1 = vld [vmem:[%s4625_s11] sm:$0xff]  ;;  %v4636_v3 = vld [vmem:[%s4625_s11 + $0x8] sm:$0xff]  ;;  %s5503_s9 = sshll.u32 %s242_s8, 6 }
  0x1a   : > { %273 = vrot.lane.b32.xlu1 %v4628_v0, %s4525_s12  ;;  %269 = vrot.lane.b32.xlu0 %v254_v1, %s4525_s12  ;;  %v256_v2 = vld [vmem:[%s4625_s11 + $0x50] sm:$0xf]  ;;  %v257_v4 = vld [vmem:[%s4625_s11 + $0x58] sm:$0xf] }
  0x1b   : > { %4237 = vmatprep.subr.msk.mxu1 %vm292_vm0, %v257_v4  ;;  %v260_v5 = vld [vmem:[%s4625_s11 + $0x60] sm:$0xf]  ;;  %v855_v8 = vld [vmem:[%s4625_s11 + $0x68] sm:$0xf]  ;;  %v853_v10 = vld [vmem:[%s4625_s11 + $0x58] sm:$0xf] }
  0x1c   : > { %4238 = vmatpush1.msk.msra.mxu1 %vm292_vm0, %v256_v2  ;;  %v854_v9 = vld [vmem:[%s4625_s11 + $0x60] sm:$0xf]  ;;  %v4699_v11 = vld [vmem:[%s4625_s11 + $0x18] sm:$0xff]  ;;  %v4720_v12 = vld [vmem:[%s4625_s11 + $0x68] sm:$0xf] }
  0x1d   : > { %405 = vmatprep.subr.mxu1 %v4636_v3  ;;  %v4727_v13 = vld [vmem:[%s4625_s11 + $0x70] sm:$0xf]  ;;  %v4734_v14 = vld [vmem:[%s4625_s11 + $0x60] sm:$0xf]  ;;  %v1780_v54 = vld [vmem:[%s4625_s11 + $0x78] sm:$0xf] }
  0x1e   : > { %275 = vrot.lane.b32.xlu1 %v256_v2, %s4525_s12  ;;  %271 = vrot.lane.b32.xlu0 %v4636_v3, %s4525_s12  ;;  %v4741_v15 = vld [vmem:[%s4625_s11 + $0x20] sm:$0xff]  ;;  %v1779_v47 = vld [vmem:[%s4625_s11 + $0x70] sm:$0xf] }
  0x1f   : > { %406 = vmatpush1.msra.mxu1 %v254_v1  ;;  %v1778_v57 = vld [vmem:[%s4625_s11 + $0x68] sm:$0xf] }
  0x20   : > { %4239 = vmatmul.mubr.msk.f32.vlgmr.msra.gmra.mxu1 %vm288_vm1, %v4661_v7 }
  0x21   : > { %639 = vmatprep.mubr.f32.mxu1 %v4526_v6 }
  0x22   : > { %279 = vrot.lane.b32.xlu1 %v260_v5, %s4525_s12  ;;  %277 = vrot.lane.b32.xlu0 %v257_v4, %s4525_s12 }
  0x26   : > { %450 = vrot.lane.b32.xlu1 %v4636_v3, %s4527_s13  ;;  %448 = vrot.lane.b32.xlu0 %v254_v1, %s4527_s13 }
  0x2a   : > { %454 = vrot.lane.b32.xlu1 %v256_v2, %s4527_s13  ;;  %452 = vrot.lane.b32.xlu0 %v4628_v0, %s4527_s13 }
  0x2e   : > { %458 = vrot.lane.b32.xlu1 %v260_v5, %s4527_s13  ;;  %456 = vrot.lane.b32.xlu0 %v257_v4, %s4527_s13 }
  0x32   : > { %551 = vrot.lane.b32.xlu1 %v4636_v3, %s4528_s16  ;;  %549 = vrot.lane.b32.xlu0 %v254_v1, %s4528_s16 }
  0x36   : > { %555 = vrot.lane.b32.xlu1 %v256_v2, %s4528_s16  ;;  %553 = vrot.lane.b32.xlu0 %v4628_v0, %s4528_s16 }
  0x3a   : > { %559 = vrot.lane.b32.xlu1 %v260_v5, %s4528_s16  ;;  %557 = vrot.lane.b32.xlu0 %v257_v4, %s4528_s16 }
  0x3e   : > { %652 = vrot.lane.b32.xlu1 %v4636_v3, %s4529_s17  ;;  %650 = vrot.lane.b32.xlu0 %v254_v1, %s4529_s17 }
  0x42   : > { %656 = vrot.lane.b32.xlu1 %v256_v2, %s4529_s17  ;;  %654 = vrot.lane.b32.xlu0 %v4628_v0, %s4529_s17 }
  0x46   : > { %660 = vrot.lane.b32.xlu1 %v260_v5, %s4529_s17  ;;  %658 = vrot.lane.b32.xlu0 %v257_v4, %s4529_s17 }
  0x4a   : > { %753 = vrot.lane.b32.xlu1 %v4636_v3, %s4530_s24  ;;  %751 = vrot.lane.b32.xlu0 %v254_v1, %s4530_s24 }
  0x4e   : > { %759 = vrot.lane.b32.xlu1 %v257_v4, %s4530_s24  ;;  %755 = vrot.lane.b32.xlu0 %v4628_v0, %s4530_s24 }
  0x52   : > { %757 = vrot.lane.b32.xlu1 %v256_v2, %s4530_s24  ;;  %761 = vrot.lane.b32.xlu0 %v260_v5, %s4530_s24  ;;  %v4857_v2 = vld [vmem:[%s4625_s11 + $0x28] sm:$0xff] }
  0x56   : > { %874 = vrot.lane.b32.xlu1 %v855_v8, %s4531_s25  ;;  %872 = vrot.lane.b32.xlu0 %v854_v9, %s4531_s25 }
  0x5a   : > { %866 = vrot.lane.b32.xlu1 %v4628_v0, %s4531_s25  ;;  %870 = vrot.lane.b32.xlu0 %v853_v10, %s4531_s25 }
  0x5e   : > { %973 = vrot.lane.b32.xlu1 %v854_v9, %s4532_s27  ;;  %868 = vrot.lane.b32.xlu0 %v4699_v11, %s4531_s25 }
  0x62   : > { %864 = vrot.lane.b32.xlu1 %v4636_v3, %s4531_s25  ;;  %975 = vrot.lane.b32.xlu0 %v855_v8, %s4532_s27 }
  0x66   : > { %967 = vrot.lane.b32.xlu1 %v4628_v0, %s4532_s27  ;;  %971 = vrot.lane.b32.xlu0 %v853_v10, %s4532_s27 }
  0x6a   : > { %1074 = vrot.lane.b32.xlu1 %v854_v9, %s4533_s29  ;;  %969 = vrot.lane.b32.xlu0 %v4699_v11, %s4532_s27 }
  0x6e   : > { %965 = vrot.lane.b32.xlu1 %v4636_v3, %s4532_s27  ;;  %1076 = vrot.lane.b32.xlu0 %v855_v8, %s4533_s29 }
  0x72   : > { %1068 = vrot.lane.b32.xlu1 %v4628_v0, %s4533_s29  ;;  %1072 = vrot.lane.b32.xlu0 %v853_v10, %s4533_s29 }
  0x76   : > { %1213 = vrot.lane.b32.xlu1 %v4720_v12, %s4525_s12  ;;  %1070 = vrot.lane.b32.xlu0 %v4699_v11, %s4533_s29 }
  0x7a   : > { %1066 = vrot.lane.b32.xlu1 %v4636_v3, %s4533_s29  ;;  %1215 = vrot.lane.b32.xlu0 %v4727_v13, %s4525_s12 }
  0x7e   : > { %1207 = vrot.lane.b32.xlu1 %v4699_v11, %s4525_s12  ;;  %1211 = vrot.lane.b32.xlu0 %v4734_v14, %s4525_s12 }
  0x82   : > { %1205 = vrot.lane.b32.xlu1 %v4628_v0, %s4525_s12  ;;  %1209 = vrot.lane.b32.xlu0 %v4741_v15, %s4525_s12 }
  0x86   : > { %1390 = vrot.lane.b32.xlu1 %v4727_v13, %s4527_s13  ;;  %1388 = vrot.lane.b32.xlu0 %v4720_v12, %s4527_s13 }
  0x8a   : > { %1382 = vrot.lane.b32.xlu1 %v4699_v11, %s4527_s13  ;;  %1386 = vrot.lane.b32.xlu0 %v4734_v14, %s4527_s13 }
  0x8c   : > { %v274_v16 = vpop.permute.xlu1 %273  ;;  %v270_v17 = vpop.permute.xlu0 %269 }
  0x8e   : > { %1487 = vrot.lane.b32.xlu1 %v4720_v12, %s4528_s16  ;;  %1384 = vrot.lane.b32.xlu0 %v4741_v15, %s4527_s13 }
  0x90   : > { %v276_v18 = vpop.permute.xlu1 %275  ;;  %v272_v19 = vpop.permute.xlu0 %271 }
  0x91   : > { %v283_v25 = vsel %vm281_vm2, %v272_v19, %v274_v16  ;;  %v282_v28 = vsel %vm281_vm2, %v270_v17, %v272_v19  ;;  %v4880_v19 = vld [vmem:[%s5561_s1 + $0x28] sm:$0xff] }
  0x92   : > { %1380 = vrot.lane.b32.xlu1 %v4628_v0, %s4527_s13  ;;  %1489 = vrot.lane.b32.xlu0 %v4727_v13, %s4528_s16 }
  0x94   : > { %v280_v20 = vpop.permute.xlu1 %279  ;;  %v278_v21 = vpop.permute.xlu0 %277 }
  0x95   : > { %v285_v22 = vsel %vm281_vm2, %v278_v21, %v280_v20  ;;  %v284_v23 = vsel %vm281_vm2, %v276_v18, %v278_v21 }
  0x96   : > { %1481 = vrot.lane.b32.xlu1 %v4699_v11, %s4528_s16  ;;  %1485 = vrot.lane.b32.xlu0 %v4734_v14, %s4528_s16 }
  0x97   : > { %4234 = vmatprep.subr.msk.mxu0 %vm292_vm0, %v285_v22 }
  0x98   : > { %4235 = vmatpush1.msk.msra.mxu0 %vm292_vm0, %v284_v23  ;;  %v451_v24 = vpop.permute.xlu1 %450  ;;  %v449_v26 = vpop.permute.xlu0 %448 }
  0x99   : > { %327 = vmatprep.subr.mxu0 %v283_v25  ;;  %v461_v37 = vsel %vm460_vm3, %v449_v26, %v451_v24 }
  0x9a   : > { %328 = vmatpush1.msra.mxu0 %v282_v28  ;;  %1586 = vrot.lane.b32.xlu1 %v4720_v12, %s4529_s17  ;;  %v4900_v28 = vld [vmem:[%s4625_s11 + $0x78] sm:$0xf] }
  0x9b   : > { %1483 = vrot.lane.b32.xlu0 %v4741_v15, %s4528_s16  ;;  %4236 = vmatmul.mubr.msk.f32.vlgmr.msra.gmra.mxu0 %vm288_vm1, %v4775_v27 }
  0x9c   : > { %v455_v29 = vpop.permute.xlu1 %454  ;;  %v453_v30 = vpop.permute.xlu0 %452  ;;  %538 = vmatprep.mubr.f32.mxu0 %v4526_v6 }
  0x9d   : > { %v462_v35 = vsel %vm460_vm3, %v451_v24, %v453_v30 }
  0x9e   : > { %1479 = vrot.lane.b32.xlu1 %v4628_v0, %s4528_s16 }
  0x9f   : > { %1588 = vrot.lane.b32.xlu0 %v4727_v13, %s4529_s17 }
  0xa0   : > { %v459_v31 = vpop.permute.xlu1 %458  ;;  %v457_v32 = vpop.permute.xlu0 %456 }
  0xa1   : > { %v463_v33 = vsel %vm460_vm3, %v455_v29, %v457_v32  ;;  %v464_v34 = vsel %vm460_vm3, %v457_v32, %v459_v31 }
  0xa2   : > { %1580 = vrot.lane.b32.xlu1 %v4699_v11, %s4529_s17  ;;  %4241 = vmatprep.subr.msk.mxu0 %vm292_vm0, %v464_v34 }
  0xa3   : > { %1584 = vrot.lane.b32.xlu0 %v4734_v14, %s4529_s17  ;;  %4242 = vmatpush1.msk.msra.mxu0 %vm292_vm0, %v463_v33  ;;  %v4907_v33 = vld [vmem:[%s5561_s1 + $0x30] sm:$0xff] }
  0xa4   : > { %v552_v38 = vpop.permute.xlu1 %551  ;;  %504 = vmatprep.subr.mxu0 %v462_v35  ;;  %v550_v39 = vpop.permute.xlu0 %549 }
  0xa5   : > { %505 = vmatpush1.msra.mxu0 %v461_v37  ;;  %v562_v49 = vsel %vm561_vm4, %v550_v39, %v552_v38  ;;  %v4915_v37 = vld [vmem:[%s4625_s11 + $0x80] sm:$0xf] }
  0xa6   : > { %1685 = vrot.lane.b32.xlu1 %v4720_v12, %s4530_s24  ;;  %4243 = vmatmul.mubr.msk.f32.vlgmr.msra.gmra.mxu0 %vm288_vm1, %v4801_v36 }
  0xa7   : > { %1582 = vrot.lane.b32.xlu0 %v4741_v15, %s4529_s17  ;;  %740 = vmatprep.mubr.f32.mxu0 %v4526_v6 }
  0xa8   : > { %v556_v40 = vpop.permute.xlu1 %555  ;;  %v554_v41 = vpop.permute.xlu0 %553 }
  0xa9   : > { %v563_v46 = vsel %vm561_vm4, %v552_v38, %v554_v41  ;;  %v4927_v41 = vld [vmem:[%s4625_s11 + $0x70] sm:$0xf] }
  0xaa   : > { %1578 = vrot.lane.b32.xlu1 %v4628_v0, %s4529_s17 }
  0xab   : > { %1687 = vrot.lane.b32.xlu0 %v4727_v13, %s4530_s24 }
  0xac   : > { %v560_v42 = vpop.permute.xlu1 %559  ;;  %v558_v43 = vpop.permute.xlu0 %557 }
  0xad   : > { %v564_v44 = vsel %vm561_vm4, %v556_v40, %v558_v43  ;;  %v565_v45 = vsel %vm561_vm4, %v558_v43, %v560_v42 }
  0xae   : > { %1679 = vrot.lane.b32.xlu1 %v4699_v11, %s4530_s24  ;;  %4245 = vmatprep.subr.msk.mxu1 %vm292_vm0, %v565_v45  ;;  %v4935_v45 = vld [vmem:[%s4625_s11 + $0x30] sm:$0xff] }
  0xaf   : > { %1683 = vrot.lane.b32.xlu0 %v4734_v14, %s4530_s24  ;;  %4246 = vmatpush1.msk.msra.mxu1 %vm292_vm0, %v564_v44 }
  0xb0   : > { %v653_v50 = vpop.permute.xlu1 %652  ;;  %v651_v51 = vpop.permute.xlu0 %650  ;;  %605 = vmatprep.subr.mxu1 %v563_v46 }
  0xb1   : > { %606 = vmatpush1.msra.mxu1 %v562_v49  ;;  %v663_v62 = vsel %vm662_vm5, %v651_v51, %v653_v50  ;;  %v4942_v49 = vld [vmem:[%s5561_s1 + $0x38] sm:$0xff] }
  0xb2   : > { %1796 = vrot.lane.b32.xlu1 %v1779_v47, %s4531_s25  ;;  %4247 = vmatmul.mubr.msk.f32.vlgmr.msra.gmra.mxu1 %vm288_vm1, %v4828_v48 }
  0xb3   : > { %1681 = vrot.lane.b32.xlu0 %v4741_v15, %s4530_s24  ;;  %841 = vmatprep.mubr.f32.mxu1 %v4526_v6 }
  0xb4   : > { %v657_v52 = vpop.permute.xlu1 %656  ;;  %v655_v53 = vpop.permute.xlu0 %654 }
  0xb5   : > { %v664_v60 = vsel %vm662_vm5, %v653_v50, %v655_v53 }
  0xb6   : > { %1677 = vrot.lane.b32.xlu1 %v4628_v0, %s4530_s24 }
  0xb7   : > { %1798 = vrot.lane.b32.xlu0 %v1780_v54, %s4531_s25 }
  0xb8   : > { %v661_v55 = vpop.permute.xlu1 %660  ;;  %v659_v56 = vpop.permute.xlu0 %658 }
  0xb9   : > { %v665_v58 = vsel %vm662_vm5, %v657_v52, %v659_v56  ;;  %v666_v59 = vsel %vm662_vm5, %v659_v56, %v661_v55 }
  0xba   : > { %1790 = vrot.lane.b32.xlu1 %v4741_v15, %s4531_s25  ;;  %4249 = vmatprep.subr.msk.mxu0 %vm292_vm0, %v666_v59 }
  0xbb   : > { %1794 = vrot.lane.b32.xlu0 %v1778_v57, %s4531_s25  ;;  %4250 = vmatpush1.msk.msra.mxu0 %vm292_vm0, %v665_v58 }
  0xbc   : > { %v754_v63 = vpop.permute.xlu1 %753  ;;  %706 = vmatprep.subr.mxu0 %v664_v60  ;;  %v752_v1 = vpop.permute.xlu0 %751  ;;  %v4968_v60 = vld [vmem:[%s5561_s1 + $0x40] sm:$0xff] }
  0xbd   : > { %707 = vmatpush1.msra.mxu0 %v663_v62  ;;  %v764_v16 = vsel %vm763_vm6, %v752_v1, %v754_v63 }
  0xbe   : > { %1895 = vrot.lane.b32.xlu1 %v1779_v47, %s4532_s27  ;;  %4251 = vmatmul.mubr.msk.f32.vlgmr.msra.gmra.mxu0 %vm288_vm1, %v4853_v61 }
  0xbf   : > { %1792 = vrot.lane.b32.xlu0 %v4857_v2, %s4531_s25  ;;  %954 = vmatprep.mubr.f32.mxu0 %v4526_v6 }
  0xc0   : > { %v760_v3 = vpop.permute.xlu1 %759  ;;  %v756_v4 = vpop.permute.xlu0 %755 }
  0xc1   : > { %v765_v13 = vsel %vm763_vm6, %v754_v63, %v756_v4 }
  0xc2   : > { %1788 = vrot.lane.b32.xlu1 %v4699_v11, %s4531_s25 }
  0xc3   : > { %1897 = vrot.lane.b32.xlu0 %v1780_v54, %s4532_s27 }
  0xc4   : > { %v758_v5 = vpop.permute.xlu1 %757  ;;  %v762_v8 = vpop.permute.xlu0 %761 }
  0xc5   : > { %v766_v9 = vsel %vm763_vm6, %v758_v5, %v760_v3  ;;  %v767_v10 = vsel %vm763_vm6, %v760_v3, %v762_v8 }
  0xc6   : > { %1889 = vrot.lane.b32.xlu1 %v4741_v15, %s4532_s27  ;;  %4253 = vmatprep.subr.msk.mxu1 %vm292_vm0, %v767_v10 }
  0xc7   : > { %1893 = vrot.lane.b32.xlu0 %v1778_v57, %s4532_s27  ;;  %4254 = vmatpush1.msk.msra.mxu1 %vm292_vm0, %v766_v9 }
  0xc8   : > { %v875_v17 = vpop.permute.xlu1 %874  ;;  %v873_v18 = vpop.permute.xlu0 %872  ;;  %807 = vmatprep.subr.mxu1 %v765_v13 }
  0xc9   : > { %808 = vmatpush1.msra.mxu1 %v764_v16  ;;  %v880_v20 = vsel %vm876_vm7, %v873_v18, %v875_v17 }
  0xca   : > { %1994 = vrot.lane.b32.xlu1 %v1779_v47, %s4533_s29  ;;  %4257 = vmatprep.subr.msk.mxu0 %vm292_vm0, %v880_v20 }
  0xcb   : > { %1891 = vrot.lane.b32.xlu0 %v4857_v2, %s4532_s27  ;;  %4255 = vmatmul.mubr.msk.f32.vlgmr.msra.gmra.mxu1 %vm288_vm1, %v4880_v19 }
  0xcc   : > { %v867_v21 = vpop.permute.xlu1 %866  ;;  %v871_v22 = vpop.permute.xlu0 %870  ;;  %1055 = vmatprep.mubr.f32.mxu1 %v4526_v6 }
  0xcd   : > { %v879_v23 = vsel %vm876_vm7, %v871_v22, %v873_v18 }
  0xce   : > { %1887 = vrot.lane.b32.xlu1 %v4699_v11, %s4532_s27  ;;  %4258 = vmatpush1.msk.msra.mxu0 %vm292_vm0, %v879_v23 }
  0xcf   : > { %1996 = vrot.lane.b32.xlu0 %v1780_v54, %s4533_s29 }
  0xd0   : > { %v974_v24 = vpop.permute.xlu1 %973  ;;  %v869_v25 = vpop.permute.xlu0 %868 }
  0xd1   : > { %v878_v26 = vsel %vm876_vm7, %v867_v21, %v869_v25 }
  0xd2   : > { %1988 = vrot.lane.b32.xlu1 %v4741_v15, %s4533_s29  ;;  %920 = vmatprep.subr.mxu0 %v878_v26 }
  0xd3   : > { %1992 = vrot.lane.b32.xlu0 %v1778_v57, %s4533_s29 }
  0xd4   : > { %v865_v29 = vpop.permute.xlu1 %864  ;;  %v976_v30 = vpop.permute.xlu0 %975 }
  0xd5   : > { %v877_v31 = vsel %vm876_vm7, %v865_v29, %v867_v21  ;;  %v981_v32 = vsel %vm977_vm8, %v974_v24, %v976_v30 }
  0xd6   : > { %2132 = vrot.lane.b32.xlu1 %v4900_v28, %s4525_s12  ;;  %921 = vmatpush1.msra.mxu0 %v877_v31  ;;  %v2698_v31 = vld [vmem:[%s4625_s11 + $0x80] sm:$0xf] }
  0xd7   : > { %1990 = vrot.lane.b32.xlu0 %v4857_v2, %s4533_s29  ;;  %4261 = vmatprep.subr.msk.mxu1 %vm292_vm0, %v981_v32 }
  0xd8   : > { %v968_v34 = vpop.permute.xlu1 %967  ;;  %v972_v35 = vpop.permute.xlu0 %971  ;;  %4259 = vmatmul.mubr.msk.f32.vlgmr.msra.gmra.mxu0 %vm288_vm1, %v4907_v33 }
  0xd9   : > { %v980_v38 = vsel %vm977_vm8, %v972_v35, %v974_v24  ;;  %1156 = vmatprep.mubr.f32.mxu0 %v4526_v6 }
  0xda   : > { %1986 = vrot.lane.b32.xlu1 %v4699_v11, %s4533_s29  ;;  %4262 = vmatpush1.msk.msra.mxu1 %vm292_vm0, %v980_v38 }
  0xdb   : > { %2134 = vrot.lane.b32.xlu0 %v4915_v37, %s4525_s12 }
  0xdc   : > { %v1075_v39 = vpop.permute.xlu1 %1074  ;;  %v970_v40 = vpop.permute.xlu0 %969 }
  0xdd   : > { %v979_v42 = vsel %vm977_vm8, %v968_v34, %v970_v40 }
  0xde   : > { %2126 = vrot.lane.b32.xlu1 %v4857_v2, %s4525_s12  ;;  %1021 = vmatprep.subr.mxu1 %v979_v42 }
  0xdf   : > { %2130 = vrot.lane.b32.xlu0 %v4927_v41, %s4525_s12 }
  0xe0   : > { %v966_v43 = vpop.permute.xlu1 %965  ;;  %v1077_v44 = vpop.permute.xlu0 %1076 }
  0xe1   : > { %v978_v46 = vsel %vm977_vm8, %v966_v43, %v968_v34  ;;  %v1082_v47 = vsel %vm1078_vm9, %v1075_v39, %v1077_v44  ;;  %v2697_v44 = vld [vmem:[%s4625_s11 + $0x78] sm:$0xf] }
  0xe2   : > { %2124 = vrot.lane.b32.xlu1 %v4741_v15, %s4525_s12  ;;  %1022 = vmatpush1.msra.mxu1 %v978_v46 }
  0xe3   : > { %2128 = vrot.lane.b32.xlu0 %v4935_v45, %s4525_s12  ;;  %4265 = vmatprep.subr.msk.mxu0 %vm292_vm0, %v1082_v47 }
  0xe4   : > { %v1069_v50 = vpop.permute.xlu1 %1068  ;;  %v1073_v51 = vpop.permute.xlu0 %1072  ;;  %4263 = vmatmul.mubr.msk.f32.vlgmr.msra.gmra.mxu1 %vm288_vm1, %v4942_v49 }
  0xe5   : > { %v1081_v52 = vsel %vm1078_vm9, %v1073_v51, %v1075_v39  ;;  %1294 = vmatprep.mubr.f32.mxu1 %v4526_v6  ;;  %v2699_v39 = vld [vmem:[%s4625_s11 + $0x88] sm:$0xf]  ;;  %v5062_v51 = vld [vmem:[%s4625_s11 + $0x38] sm:$0xff] }
  0xe6   : > { %2309 = vrot.lane.b32.xlu1 %v4915_v37, %s4527_s13  ;;  %4266 = vmatpush1.msk.msra.mxu0 %vm292_vm0, %v1081_v52 }
  0xe7   : > { %2307 = vrot.lane.b32.xlu0 %v4900_v28, %s4527_s13 }
  0xe8   : > { %v1214_v53 = vpop.permute.xlu1 %1213  ;;  %v1071_v54 = vpop.permute.xlu0 %1070 }
  0xe9   : > { %v1080_v55 = vsel %vm1078_vm9, %v1069_v50, %v1071_v54 }
  0xea   : > { %2301 = vrot.lane.b32.xlu1 %v4857_v2, %s4527_s13  ;;  %1122 = vmatprep.subr.mxu0 %v1080_v55 }
  0xeb   : > { %2305 = vrot.lane.b32.xlu0 %v4927_v41, %s4527_s13 }
  0xec   : > { %v1067_v56 = vpop.permute.xlu1 %1066  ;;  %v1216_v57 = vpop.permute.xlu0 %1215 }
  0xed   : > { %v1079_v58 = vsel %vm1078_vm9, %v1067_v56, %v1069_v50  ;;  %v1220_v59 = vsel %vm281_vm2, %v1214_v53, %v1216_v57 }
  0xee   : > { %2406 = vrot.lane.b32.xlu1 %v4900_v28, %s4528_s16  ;;  %1123 = vmatpush1.msra.mxu0 %v1079_v58 }
  0xef   : > { %2303 = vrot.lane.b32.xlu0 %v4935_v45, %s4527_s13  ;;  %4269 = vmatprep.subr.msk.mxu1 %vm292_vm0, %v1220_v59 }
  0xf0   : > { %v1208_v62 = vpop.permute.xlu1 %1207  ;;  %v1212_v63 = vpop.permute.xlu0 %1211  ;;  %4272 = vmatprep.subr.msk.mxu0 %vm292_vm0, %v4720_v12  ;;  %4267 = vmatmul.mubr.msk.f32.vlgmr.msra.gmra.mxu0 %vm288_vm1, %v4968_v60 }
  0xf1   : > { %v1219_v1 = vsel %vm281_vm2, %v1212_v63, %v1214_v53  ;;  %4273 = vmatpush1.msk.msra.mxu0 %vm292_vm0, %v4734_v14  ;;  %1372 = vmatprep.mubr.f32.mxu0 %v4526_v6 }
  0xf2   : > { %2299 = vrot.lane.b32.xlu1 %v4741_v15, %s4527_s13  ;;  %4270 = vmatpush1.msk.msra.mxu1 %vm292_vm0, %v1219_v1 }
  0xf3   : > { %2408 = vrot.lane.b32.xlu0 %v4915_v37, %s4528_s16  ;;  %1338 = vmatprep.subr.mxu0 %v4699_v11 }
  0xf4   : > { %v1206_v12 = vpop.permute.xlu1 %1205  ;;  %v1210_v3 = vpop.permute.xlu0 %1209  ;;  %1339 = vmatpush1.msra.mxu0 %v4628_v0 }
  0xf5   : > { %v1217_v4 = vsel %vm281_vm2, %v1206_v12, %v1208_v62  ;;  %v1218_v14 = vsel %vm281_vm2, %v1208_v62, %v1210_v3  ;;  %4274 = vmatmul.mubr.msk.f32.vlgmr.msra.gmra.mxu0 %vm288_vm1, %v4661_v7 }
  0xf6   : > { %2400 = vrot.lane.b32.xlu1 %v4857_v2, %s4528_s16  ;;  %1260 = vmatprep.subr.mxu1 %v1218_v14 }
  0xf7   : > { %2404 = vrot.lane.b32.xlu0 %v4927_v41, %s4528_s16  ;;  %1261 = vmatpush1.msra.mxu1 %v1217_v4 }
  0xf8   : > { %v1391_v11 = vpop.permute.xlu1 %1390  ;;  %v1389_v5 = vpop.permute.xlu0 %1388  ;;  %4271 = vmatmul.mubr.msk.f32.vlgmr.msra.gmra.mxu1 %vm288_vm1, %v4775_v27  ;;  %1568 = vmatprep.mubr.f32.mxu0 %v4526_v6 }
  0xf9   : > { %v1395_v0 = vsel %vm460_vm3, %v1389_v5, %v1391_v11  ;;  %1469 = vmatprep.mubr.f32.mxu1 %v4526_v6 }
  0xfa   : > { %2505 = vrot.lane.b32.xlu1 %v4900_v28, %s4529_s17  ;;  %4276 = vmatprep.subr.msk.mxu1 %vm292_vm0, %v1395_v0 }
  0xfb   : > { %2402 = vrot.lane.b32.xlu0 %v4935_v45, %s4528_s16 }
  0xfc   : > { %v1383_v8 = vpop.permute.xlu1 %1382  ;;  %v1387_v9 = vpop.permute.xlu0 %1386 }
  0xfd   : > { %v1394_v10 = vsel %vm460_vm3, %v1387_v9, %v1389_v5  ;;  %v5101_v9 = vld [vmem:[%s4625_s11 + $0x88] sm:$0xf] }
  0xfe   : > { %2398 = vrot.lane.b32.xlu1 %v4741_v15, %s4528_s16  ;;  %4277 = vmatpush1.msk.msra.mxu1 %vm292_vm0, %v1394_v10 }
  0xff   : > { %2507 = vrot.lane.b32.xlu0 %v4915_v37, %s4529_s17 }
 0x100   : > { %v1488_v13 = vpop.permute.xlu1 %1487  ;;  %v1385_v16 = vpop.permute.xlu0 %1384 }
 0x101   : > { %v1393_v17 = vsel %vm460_vm3, %v1383_v8, %v1385_v16 }
 0x102   : > { %2499 = vrot.lane.b32.xlu1 %v4857_v2, %s4529_s17  ;;  %1435 = vmatprep.subr.mxu1 %v1393_v17 }
 0x103   : > { %2503 = vrot.lane.b32.xlu0 %v4927_v41, %s4529_s17 }
 0x104   : > { %v1381_v18 = vpop.permute.xlu1 %1380  ;;  %v1490_v20 = vpop.permute.xlu0 %1489 }
 0x105   : > { %v1392_v21 = vsel %vm460_vm3, %v1381_v18, %v1383_v8  ;;  %v1494_v22 = vsel %vm561_vm4, %v1488_v13, %v1490_v20  ;;  %v5111_v20 = vld [vmem:[%s4625_s11 + $0x90] sm:$0xf] }
 0x106   : > { %2604 = vrot.lane.b32.xlu1 %v4900_v28, %s4530_s24  ;;  %1436 = vmatpush1.msra.mxu1 %v1392_v21 }
 0x107   : > { %2501 = vrot.lane.b32.xlu0 %v4935_v45, %s4529_s17  ;;  %4280 = vmatprep.subr.msk.mxu0 %vm292_vm0, %v1494_v22 }
 0x108   : > { %v1482_v23 = vpop.permute.xlu1 %1481  ;;  %v1486_v24 = vpop.permute.xlu0 %1485  ;;  %4278 = vmatmul.mubr.msk.f32.vlgmr.msra.gmra.mxu1 %vm288_vm1, %v4801_v36 }
 0x109   : > { %v1493_v25 = vsel %vm561_vm4, %v1486_v24, %v1488_v13  ;;  %1667 = vmatprep.mubr.f32.mxu1 %v4526_v6  ;;  %v5123_v24 = vld [vmem:[%s4625_s11 + $0x80] sm:$0xf] }
 0x10a   : > { %2497 = vrot.lane.b32.xlu1 %v4741_v15, %s4529_s17  ;;  %4281 = vmatpush1.msk.msra.mxu0 %vm292_vm0, %v1493_v25 }
 0x10b   : > { %2606 = vrot.lane.b32.xlu0 %v4915_v37, %s4530_s24 }
 0x10c   : > { %v1587_v26 = vpop.permute.xlu1 %1586 }
 0x10d   : > { %v1484_v29 = vpop.permute.xlu0 %1483 }
 0x10e   : > { %2598 = vrot.lane.b32.xlu1 %v4857_v2, %s4530_s24  ;;  %v1492_v30 = vsel %vm561_vm4, %v1482_v23, %v1484_v29 }
 0x10f   : > { %2602 = vrot.lane.b32.xlu0 %v4927_v41, %s4530_s24  ;;  %1534 = vmatprep.subr.mxu0 %v1492_v30  ;;  %v5131_v30 = vld [vmem:[%s4625_s11 + $0x40] sm:$0xff] }
 0x110   : > { %v1480_v32 = vpop.permute.xlu1 %1479 }
 0x111   : > { %v1491_v34 = vsel %vm561_vm4, %v1480_v32, %v1482_v23  ;;  %v1589_v35 = vpop.permute.xlu0 %1588 }
 0x112   : > { %v1593_v37 = vsel %vm662_vm5, %v1587_v26, %v1589_v35  ;;  %2715 = vrot.lane.b32.xlu1 %v2698_v31, %s4531_s25  ;;  %1535 = vmatpush1.msra.mxu0 %v1491_v34 }
 0x113   : > { %2600 = vrot.lane.b32.xlu0 %v4935_v45, %s4530_s24  ;;  %4284 = vmatprep.subr.msk.mxu1 %vm292_vm0, %v1593_v37 }
 0x114   : > { %v1581_v38 = vpop.permute.xlu1 %1580  ;;  %4282 = vmatmul.mubr.msk.f32.vlgmr.msra.gmra.mxu0 %vm288_vm1, %v4828_v48 }
 0x115   : > { %v1585_v40 = vpop.permute.xlu0 %1584  ;;  %1766 = vmatprep.mubr.f32.mxu0 %v4526_v6 }
 0x116   : > { %v1592_v42 = vsel %vm662_vm5, %v1585_v40, %v1587_v26  ;;  %2596 = vrot.lane.b32.xlu1 %v4741_v15, %s4530_s24 }
 0x117   : > { %2717 = vrot.lane.b32.xlu0 %v2699_v39, %s4531_s25  ;;  %4285 = vmatpush1.msk.msra.mxu1 %vm292_vm0, %v1592_v42 }
 0x118   : > { %v1686_v43 = vpop.permute.xlu1 %1685 }
 0x119   : > { %v1583_v46 = vpop.permute.xlu0 %1582 }
 0x11a   : > { %2709 = vrot.lane.b32.xlu1 %v4935_v45, %s4531_s25  ;;  %v1591_v47 = vsel %vm662_vm5, %v1581_v38, %v1583_v46 }
 0x11b   : > { %2713 = vrot.lane.b32.xlu0 %v2697_v44, %s4531_s25  ;;  %1633 = vmatprep.subr.mxu1 %v1591_v47 }
 0x11c   : > { %v1579_v50 = vpop.permute.xlu1 %1578 }
 0x11d   : > { %v1590_v52 = vsel %vm662_vm5, %v1579_v50, %v1581_v38  ;;  %v1688_v53 = vpop.permute.xlu0 %1687 }
 0x11e   : > { %v1692_v54 = vsel %vm763_vm6, %v1686_v43, %v1688_v53  ;;  %2814 = vrot.lane.b32.xlu1 %v2698_v31, %s4532_s27  ;;  %1634 = vmatpush1.msra.mxu1 %v1590_v52 }
 0x11f   : > { %2711 = vrot.lane.b32.xlu0 %v5062_v51, %s4531_s25  ;;  %4288 = vmatprep.subr.msk.mxu0 %vm292_vm0, %v1692_v54 }
 0x120   : > { %v1680_v55 = vpop.permute.xlu1 %1679  ;;  %4286 = vmatmul.mubr.msk.f32.vlgmr.msra.gmra.mxu1 %vm288_vm1, %v4853_v61 }
 0x121   : > { %v1684_v56 = vpop.permute.xlu0 %1683  ;;  %1877 = vmatprep.mubr.f32.mxu1 %v4526_v6 }
 0x122   : > { %v1691_v57 = vsel %vm763_vm6, %v1684_v56, %v1686_v43  ;;  %2707 = vrot.lane.b32.xlu1 %v4857_v2, %s4531_s25 }
 0x123   : > { %2816 = vrot.lane.b32.xlu0 %v2699_v39, %s4532_s27  ;;  %4289 = vmatpush1.msk.msra.mxu0 %vm292_vm0, %v1691_v57 }
 0x124   : > { %v1797_v58 = vpop.permute.xlu1 %1796 }
 0x125   : > { %v1682_v59 = vpop.permute.xlu0 %1681 }
 0x126   : > { %2808 = vrot.lane.b32.xlu1 %v4935_v45, %s4532_s27  ;;  %v1690_v62 = vsel %vm763_vm6, %v1680_v55, %v1682_v59 }
 0x127   : > { %2812 = vrot.lane.b32.xlu0 %v2697_v44, %s4532_s27  ;;  %1732 = vmatprep.subr.mxu0 %v1690_v62 }
 0x128   : > { %v1678_v63 = vpop.permute.xlu1 %1677 }
 0x129   : > { %v1689_v1 = vsel %vm763_vm6, %v1678_v63, %v1680_v55  ;;  %v1799_v12 = vpop.permute.xlu0 %1798 }
 0x12a   : > { %v1803_v3 = vsel %vm876_vm7, %v1797_v58, %v1799_v12  ;;  %2913 = vrot.lane.b32.xlu1 %v2698_v31, %s4533_s29  ;;  %1733 = vmatpush1.msra.mxu0 %v1689_v1 }
 0x12b   : > { %2810 = vrot.lane.b32.xlu0 %v5062_v51, %s4532_s27  ;;  %4292 = vmatprep.subr.msk.mxu1 %vm292_vm0, %v1803_v3 }
 0x12c   : > { %v1791_v4 = vpop.permute.xlu1 %1790  ;;  %4290 = vmatmul.mubr.msk.f32.vlgmr.msra.gmra.mxu0 %vm288_vm1, %v4880_v19 }
 0x12d   : > { %v1795_v14 = vpop.permute.xlu0 %1794  ;;  %1976 = vmatprep.mubr.f32.mxu0 %v4526_v6 }
 0x12e   : > { %v1802_v11 = vsel %vm876_vm7, %v1795_v14, %v1797_v58  ;;  %2806 = vrot.lane.b32.xlu1 %v4857_v2, %s4532_s27 }
 0x12f   : > { %2915 = vrot.lane.b32.xlu0 %v2699_v39, %s4533_s29  ;;  %4293 = vmatpush1.msk.msra.mxu1 %vm292_vm0, %v1802_v11 }
 0x130   : > { %v1896_v5 = vpop.permute.xlu1 %1895 }
 0x131   : > { %v1793_v0 = vpop.permute.xlu0 %1792 }
 0x132   : > { %2907 = vrot.lane.b32.xlu1 %v4935_v45, %s4533_s29  ;;  %v1801_v8 = vsel %vm876_vm7, %v1791_v4, %v1793_v0 }
 0x133   : > { %2911 = vrot.lane.b32.xlu0 %v2697_v44, %s4533_s29  ;;  %1843 = vmatprep.subr.mxu1 %v1801_v8  ;;  %v3617_v8 = vld [vmem:[%s4625_s11 + $0x90] sm:$0xf] }
 0x134   : > { %v1789_v10 = vpop.permute.xlu1 %1788 }
 0x135   : > { %v1800_v13 = vsel %vm876_vm7, %v1789_v10, %v1791_v4  ;;  %v1898_v16 = vpop.permute.xlu0 %1897 }
 0x136   : > { %v1902_v17 = vsel %vm977_vm8, %v1896_v5, %v1898_v16  ;;  %3051 = vrot.lane.b32.xlu1 %v5101_v9, %s4525_s12  ;;  %1844 = vmatpush1.msra.mxu1 %v1800_v13 }
 0x137   : > { %2909 = vrot.lane.b32.xlu0 %v5062_v51, %s4533_s29  ;;  %4296 = vmatprep.subr.msk.mxu0 %vm292_vm0, %v1902_v17 }
 0x138   : > { %v1890_v18 = vpop.permute.xlu1 %1889  ;;  %4294 = vmatmul.mubr.msk.f32.vlgmr.msra.gmra.mxu1 %vm288_vm1, %v4907_v33 }
 0x139   : > { %v1894_v21 = vpop.permute.xlu0 %1893  ;;  %2075 = vmatprep.mubr.f32.mxu1 %v4526_v6 }
 0x13a   : > { %v1901_v22 = vsel %vm977_vm8, %v1894_v21, %v1896_v5  ;;  %2905 = vrot.lane.b32.xlu1 %v4857_v2, %s4533_s29 }
 0x13b   : > { %3053 = vrot.lane.b32.xlu0 %v5111_v20, %s4525_s12  ;;  %4297 = vmatpush1.msk.msra.mxu0 %vm292_vm0, %v1901_v22 }
 0x13c   : > { %v1995_v23 = vpop.permute.xlu1 %1994 }
 0x13d   : > { %v1892_v25 = vpop.permute.xlu0 %1891 }
 0x13e   : > { %3045 = vrot.lane.b32.xlu1 %v5062_v51, %s4525_s12  ;;  %v1900_v26 = vsel %vm977_vm8, %v1890_v18, %v1892_v25  ;;  %v3616_v25 = vld [vmem:[%s4625_s11 + $0x88] sm:$0xf] }
 0x13f   : > { %3049 = vrot.lane.b32.xlu0 %v5123_v24, %s4525_s12  ;;  %1942 = vmatprep.subr.mxu0 %v1900_v26 }
 0x140   : > { %v1888_v29 = vpop.permute.xlu1 %1887 }
 0x141   : > { %v1899_v31 = vsel %vm977_vm8, %v1888_v29, %v1890_v18  ;;  %v1997_v32 = vpop.permute.xlu0 %1996 }
 0x142   : > { %v2001_v34 = vsel %vm1078_vm9, %v1995_v23, %v1997_v32  ;;  %3043 = vrot.lane.b32.xlu1 %v4935_v45, %s4525_s12  ;;  %1943 = vmatpush1.msra.mxu0 %v1899_v31  ;;  %v3615_v31 = vld [vmem:[%s4625_s11 + $0x48] sm:$0xff] }
 0x143   : > { %3047 = vrot.lane.b32.xlu0 %v5131_v30, %s4525_s12  ;;  %4300 = vmatprep.subr.msk.mxu1 %vm292_vm0, %v2001_v34 }
 0x144   : > { %v1989_v35 = vpop.permute.xlu1 %1988  ;;  %4298 = vmatmul.mubr.msk.f32.vlgmr.msra.gmra.mxu0 %vm288_vm1, %v4942_v49 }
 0x145   : > { %v1993_v37 = vpop.permute.xlu0 %1992  ;;  %2213 = vmatprep.mubr.f32.mxu0 %v4526_v6 }
 0x146   : > { %v2000_v38 = vsel %vm1078_vm9, %v1993_v37, %v1995_v23  ;;  %3228 = vrot.lane.b32.xlu1 %v5111_v20, %s4527_s13 }
 0x147   : > { %3226 = vrot.lane.b32.xlu0 %v5101_v9, %s4527_s13  ;;  %4301 = vmatpush1.msk.msra.mxu1 %vm292_vm0, %v2000_v38 }
 0x148   : > { %v2133_v39 = vpop.permute.xlu1 %2132 }
 0x149   : > { %v1991_v40 = vpop.permute.xlu0 %1990 }
 0x14a   : > { %3220 = vrot.lane.b32.xlu1 %v5062_v51, %s4527_s13  ;;  %v1999_v42 = vsel %vm1078_vm9, %v1989_v35, %v1991_v40 }
 0x14b   : > { %3224 = vrot.lane.b32.xlu0 %v5123_v24, %s4527_s13  ;;  %2041 = vmatprep.subr.mxu1 %v1999_v42 }
 0x14c   : > { %v1987_v43 = vpop.permute.xlu1 %1986 }
 0x14d   : > { %v1998_v44 = vsel %vm1078_vm9, %v1987_v43, %v1989_v35  ;;  %v2135_v46 = vpop.permute.xlu0 %2134 }
 0x14e   : > { %v2139_v47 = vsel %vm281_vm2, %v2133_v39, %v2135_v46  ;;  %3325 = vrot.lane.b32.xlu1 %v5101_v9, %s4528_s16  ;;  %2042 = vmatpush1.msra.mxu1 %v1998_v44 }
 0x14f   : > { %3222 = vrot.lane.b32.xlu0 %v5131_v30, %s4527_s13  ;;  %4304 = vmatprep.subr.msk.mxu0 %vm292_vm0, %v2139_v47 }
 0x150   : > { %v2127_v50 = vpop.permute.xlu1 %2126  ;;  %4307 = vmatprep.subr.msk.mxu1 %vm292_vm0, %v4900_v28  ;;  %4302 = vmatmul.mubr.msk.f32.vlgmr.msra.gmra.mxu1 %vm288_vm1, %v4968_v60 }
 0x151   : > { %v2131_v52 = vpop.permute.xlu0 %2130  ;;  %4308 = vmatpush1.msk.msra.mxu1 %vm292_vm0, %v4927_v41  ;;  %2291 = vmatprep.mubr.f32.mxu1 %v4526_v6 }
 0x152   : > { %v2138_v53 = vsel %vm281_vm2, %v2131_v52, %v2133_v39  ;;  %3218 = vrot.lane.b32.xlu1 %v4935_v45, %s4527_s13  ;;  %2257 = vmatprep.subr.mxu1 %v4857_v2 }
 0x153   : > { %3327 = vrot.lane.b32.xlu0 %v5111_v20, %s4528_s16  ;;  %4305 = vmatpush1.msk.msra.mxu0 %vm292_vm0, %v2138_v53 }
 0x154   : > { %v2125_v28 = vpop.permute.xlu1 %2124  ;;  %2258 = vmatpush1.msra.mxu1 %v4741_v15 }
 0x155   : > { %v2136_v54 = vsel %vm281_vm2, %v2125_v28, %v2127_v50  ;;  %v2129_v41 = vpop.permute.xlu0 %2128  ;;  %4309 = vmatmul.mubr.msk.f32.vlgmr.msra.gmra.mxu1 %vm288_vm1, %v4661_v7 }
 0x156   : > { %3319 = vrot.lane.b32.xlu1 %v5062_v51, %s4528_s16  ;;  %v2137_v55 = vsel %vm281_vm2, %v2127_v50, %v2129_v41  ;;  %2487 = vmatprep.mubr.f32.mxu1 %v4526_v6 }
 0x157   : > { %3323 = vrot.lane.b32.xlu0 %v5123_v24, %s4528_s16  ;;  %2179 = vmatprep.subr.mxu0 %v2137_v55 }
 0x158   : > { %2180 = vmatpush1.msra.mxu0 %v2136_v54  ;;  %v2310_v2 = vpop.permute.xlu1 %2309 }
 0x159   : > { %v2308_v15 = vpop.permute.xlu0 %2307  ;;  %4306 = vmatmul.mubr.msk.f32.vlgmr.msra.gmra.mxu0 %vm288_vm1, %v4775_v27 }
 0x15a   : > { %3424 = vrot.lane.b32.xlu1 %v5101_v9, %s4529_s17  ;;  %v2314_v7 = vsel %vm460_vm3, %v2308_v15, %v2310_v2  ;;  %2388 = vmatprep.mubr.f32.mxu0 %v4526_v6 }
 0x15b   : > { %3321 = vrot.lane.b32.xlu0 %v5131_v30, %s4528_s16  ;;  %4311 = vmatprep.subr.msk.mxu0 %vm292_vm0, %v2314_v7 }
 0x15c   : > { %v2302_v56 = vpop.permute.xlu1 %2301 }
 0x15d   : > { %v2306_v57 = vpop.permute.xlu0 %2305 }
 0x15e   : > { %v2313_v58 = vsel %vm460_vm3, %v2306_v57, %v2308_v15  ;;  %3317 = vrot.lane.b32.xlu1 %v4935_v45, %s4528_s16  ;;  %s5512_s16 = scalar_lea.hbm %s5565_s5, %s4378_s10 }
 0x15f   : > { %3426 = vrot.lane.b32.xlu0 %v5111_v20, %s4529_s17  ;;  %4312 = vmatpush1.msk.msra.mxu0 %vm292_vm0, %v2313_v58 }
 0x160   : > { %v2407_v27 = vpop.permute.xlu1 %2406 }
 0x161   : > { %v2304_v59 = vpop.permute.xlu0 %2303 }
 0x162   : > { %3418 = vrot.lane.b32.xlu1 %v5062_v51, %s4529_s17  ;;  %v2312_v62 = vsel %vm460_vm3, %v2302_v56, %v2304_v59 }
 0x163   : > { %3422 = vrot.lane.b32.xlu0 %v5123_v24, %s4529_s17  ;;  %2354 = vmatprep.subr.mxu0 %v2312_v62 }
 0x164   : > { %v2300_v63 = vpop.permute.xlu1 %2299 }
 0x165   : > { %v2311_v1 = vsel %vm460_vm3, %v2300_v63, %v2302_v56  ;;  %v2409_v12 = vpop.permute.xlu0 %2408 }
 0x166   : > { %v2413_v3 = vsel %vm561_vm4, %v2407_v27, %v2409_v12  ;;  %3523 = vrot.lane.b32.xlu1 %v5101_v9, %s4530_s24  ;;  %2355 = vmatpush1.msra.mxu0 %v2311_v1 }
 0x167   : > { %3420 = vrot.lane.b32.xlu0 %v5131_v30, %s4529_s17  ;;  %4315 = vmatprep.subr.msk.mxu1 %vm292_vm0, %v2413_v3 }
 0x168   : > { %v2401_v4 = vpop.permute.xlu1 %2400  ;;  %4313 = vmatmul.mubr.msk.f32.vlgmr.msra.gmra.mxu0 %vm288_vm1, %v4801_v36 }
 0x169   : > { %v2405_v14 = vpop.permute.xlu0 %2404  ;;  %2586 = vmatprep.mubr.f32.mxu0 %v4526_v6 }
 0x16a   : > { %v2412_v11 = vsel %vm561_vm4, %v2405_v14, %v2407_v27  ;;  %3416 = vrot.lane.b32.xlu1 %v4935_v45, %s4529_s17  ;;  %s4124_s17 = scalar_lea.sflag [#allocation3], %s242_s8 }
 0x16b   : > { %3525 = vrot.lane.b32.xlu0 %v5111_v20, %s4530_s24  ;;  %4316 = vmatpush1.msk.msra.mxu1 %vm292_vm0, %v2412_v11  ;;  %v3618_v20 = vld [vmem:[%s4625_s11 + $0x98] sm:$0xf]  ;;  %s244_s11 = scalar_lea.vmem [#allocation2], %s5503_s9 }
 0x16c   : > { %v2506_v5 = vpop.permute.xlu1 %2505  ;;  %s4140_s12 = sshll.u32 %s244_s11, 4  ;;  %s5514_s12 = int_to_ptr.vmem [resolvable:$true] %s4140_s12 }
 0x16d   : > { %v2403_v0 = vpop.permute.xlu0 %2402 }
 0x16e   : > { %3517 = vrot.lane.b32.xlu1 %v5062_v51, %s4530_s24  ;;  %v2411_v36 = vsel %vm561_vm4, %v2401_v4, %v2403_v0 }
 0x16f   : > { %3521 = vrot.lane.b32.xlu0 %v5123_v24, %s4530_s24  ;;  %2453 = vmatprep.subr.mxu1 %v2411_v36 }
 0x170   : > { %v2399_v10 = vpop.permute.xlu1 %2398 }
 0x171   : > { %v2410_v13 = vsel %vm561_vm4, %v2399_v10, %v2401_v4  ;;  %v2508_v16 = vpop.permute.xlu0 %2507 }
 0x172   : > { %v2512_v17 = vsel %vm662_vm5, %v2506_v5, %v2508_v16  ;;  %3634 = vrot.lane.b32.xlu1 %v3617_v8, %s4531_s25  ;;  %2454 = vmatpush1.msra.mxu1 %v2410_v13  ;;  %v3033_v13 = vld [vmem:[%s5561_s1] sm:$0xff] }
 0x173   : > { %3519 = vrot.lane.b32.xlu0 %v5131_v30, %s4530_s24  ;;  %4319 = vmatprep.subr.msk.mxu0 %vm292_vm0, %v2512_v17 }
 0x174   : > { %v2500_v18 = vpop.permute.xlu1 %2499  ;;  %4317 = vmatmul.mubr.msk.f32.vlgmr.msra.gmra.mxu1 %vm288_vm1, %v4828_v48 }
 0x175   : > { %v2504_v21 = vpop.permute.xlu0 %2503  ;;  %2685 = vmatprep.mubr.f32.mxu1 %v4526_v6 }
 0x176   : > { %v2511_v22 = vsel %vm662_vm5, %v2504_v21, %v2506_v5  ;;  %3515 = vrot.lane.b32.xlu1 %v4935_v45, %s4530_s24  ;;  %s4447_s24 = scalar_lea.vmem %s5514_s12, 1024 }
 0x177   : > { %3636 = vrot.lane.b32.xlu0 %v3618_v20, %s4531_s25  ;;  %4320 = vmatpush1.msk.msra.mxu0 %vm292_vm0, %v2511_v22  ;;  %p4448_p12 = scmp.ne.s32.totalorder %s5514_s12, %s4447_s24 }
 0x178   : > { %v2605_v23 = vpop.permute.xlu1 %2604 }
 0x179   : > { %v2502_v26 = vpop.permute.xlu0 %2501  ;;  %p4449_p13 = pnand %p4448_p12, %p4605_p4 }
 0x17a   : > { %3628 = vrot.lane.b32.xlu1 %v5131_v30, %s4531_s25  ;;  %v2510_v48 = vsel %vm662_vm5, %v2500_v18, %v2502_v26 }
 0x17b   : > { %3632 = vrot.lane.b32.xlu0 %v3616_v25, %s4531_s25  ;;  %2552 = vmatprep.subr.mxu0 %v2510_v48  ;;  %p4450_p0 = pneg %p4449_p13 }
 0x17c   : > { %v2498_v29 = vpop.permute.xlu1 %2497 }
 0x17d   : > { %v2509_v32 = vsel %vm662_vm5, %v2498_v29, %v2500_v18  ;;  %v2607_v34 = vpop.permute.xlu0 %2606  ;;  %v4338_v18 = vld [vmem:[%s5561_s1 + $0x8] sm:$0xff] }
 0x17e   : > { %v2611_v35 = vsel %vm763_vm6, %v2605_v23, %v2607_v34  ;;  %3733 = vrot.lane.b32.xlu1 %v3617_v8, %s4532_s27  ;;  %2553 = vmatpush1.msra.mxu0 %v2509_v32 }
 0x17f   : > { %3630 = vrot.lane.b32.xlu0 %v3615_v31, %s4531_s25  ;;  %4323 = vmatprep.subr.msk.mxu1 %vm292_vm0, %v2611_v35 }
 0x180   : > { %v2599_v37 = vpop.permute.xlu1 %2598  ;;  %4321 = vmatmul.mubr.msk.f32.vlgmr.msra.gmra.mxu0 %vm288_vm1, %v4853_v61 }
 0x181   : > { %v2603_v38 = vpop.permute.xlu0 %2602  ;;  %2796 = vmatprep.mubr.f32.mxu0 %v4526_v6 }
 0x182   : > { %v2610_v39 = vsel %vm763_vm6, %v2603_v38, %v2605_v23  ;;  %3626 = vrot.lane.b32.xlu1 %v5062_v51, %s4531_s25  ;;  %v441_v23 = vpop.f32.mrf.mxu1  ;;  %s4534_s25 = smov [#allocation2]  }
 0x183   : > { %3735 = vrot.lane.b32.xlu0 %v3618_v20, %s4532_s27  ;;  %4324 = vmatpush1.msk.msra.mxu1 %vm292_vm0, %v2610_v39 }
 0x184   : > { %v2716_v40 = vpop.permute.xlu1 %2715  ;;  %v443_v29 = vpop.f32.mrf.mxu1 }
 0x185   : > { %v2601_v42 = vpop.permute.xlu0 %2600 }
 0x186   : > { %3727 = vrot.lane.b32.xlu1 %v5131_v30, %s4532_s27  ;;  %v2609_v43 = vsel %vm763_vm6, %v2599_v37, %v2601_v42 }
 0x187   : > { %3731 = vrot.lane.b32.xlu0 %v3616_v25, %s4532_s27  ;;  %2651 = vmatprep.subr.mxu1 %v2609_v43  ;;  %v4345_v43 = vld [vmem:[%s5561_s1 + $0x10] sm:$0xff] }
 0x188   : > { %v2597_v61 = vpop.permute.xlu1 %2596 }
 0x189   : > { %v2608_v44 = vsel %vm763_vm6, %v2597_v61, %v2599_v37  ;;  %v2718_v46 = vpop.permute.xlu0 %2717 }
 0x18a   : > { %v2722_v47 = vsel %vm876_vm7, %v2716_v40, %v2718_v46  ;;  %3832 = vrot.lane.b32.xlu1 %v3617_v8, %s4533_s29  ;;  %2652 = vmatpush1.msra.mxu1 %v2608_v44 }
 0x18b   : > { %3729 = vrot.lane.b32.xlu0 %v3615_v31, %s4532_s27  ;;  %4327 = vmatprep.subr.msk.mxu0 %vm292_vm0, %v2722_v47 }
 0x18c   : > { %v2710_v50 = vpop.permute.xlu1 %2709  ;;  %4325 = vmatmul.mubr.msk.f32.vlgmr.msra.gmra.mxu1 %vm288_vm1, %v4880_v19 }
 0x18d   : > { %v2714_v52 = vpop.permute.xlu0 %2713  ;;  %2895 = vmatprep.mubr.f32.mxu1 %v4526_v6 }
 0x18e   : > { %v2721_v53 = vsel %vm876_vm7, %v2714_v52, %v2716_v40  ;;  %3725 = vrot.lane.b32.xlu1 %v5062_v51, %s4532_s27  ;;  %v641_v40 = vpop.f32.mrf.mxu1  ;;  %s4451_s27 = sshll.u32 %s4534_s25, 4  ;;  %s4452_s27 = int_to_ptr.vmem [resolvable:$false] %s4451_s27 }
 0x18f   : > { %3834 = vrot.lane.b32.xlu0 %v3618_v20, %s4533_s29  ;;  %4328 = vmatpush1.msk.msra.mxu0 %vm292_vm0, %v2721_v53  ;;  %p4454_p1 = scmp.lt.s32.totalorder %s5514_s12, %s4452_s27 }
 0x190   : > { %v2815_v28 = vpop.permute.xlu1 %2814  ;;  %v643_v52 = vpop.f32.mrf.mxu1 }
 0x191   : > { %v2712_v54 = vpop.permute.xlu0 %2711 }
 0x192   : > { %3826 = vrot.lane.b32.xlu1 %v5131_v30, %s4533_s29  ;;  %v2720_v41 = vsel %vm876_vm7, %v2710_v50, %v2712_v54 }
 0x193   : > { %3830 = vrot.lane.b32.xlu0 %v3616_v25, %s4533_s29  ;;  %2762 = vmatprep.subr.mxu0 %v2720_v41 }
 0x194   : > { %v2708_v19 = vpop.permute.xlu1 %2707 }
 0x195   : > { %v2719_v55 = vsel %vm876_vm7, %v2708_v19, %v2710_v50  ;;  %v2817_v2 = vpop.permute.xlu0 %2816 }
 0x196   : > { %v2821_v15 = vsel %vm977_vm8, %v2815_v28, %v2817_v2  ;;  %3824 = vrot.lane.b32.xlu1 %v5062_v51, %s4533_s29  ;;  %2763 = vmatpush1.msra.mxu0 %v2719_v55 }
 0x197   : > { %3828 = vrot.lane.b32.xlu0 %v3615_v31, %s4533_s29  ;;  %4331 = vmatprep.subr.msk.mxu1 %vm292_vm0, %v2821_v15  ;;  %v843_v15 = vpop.f32.mrf.mxu1  ;;  %s4453_s29 = scalar_lea.vmem %s4452_s27, 2048 }
 0x198   : > { %v2809_v30 = vpop.permute.xlu1 %2808  ;;  %4329 = vmatmul.mubr.msk.f32.vlgmr.msra.gmra.mxu0 %vm288_vm1, %v4907_v33  ;;  %p4455_p2 = scmp.lt.s32.totalorder %s4453_s29, %s4447_s24 }
 0x199   : > { %v2813_v7 = vpop.permute.xlu0 %2812  ;;  %2994 = vmatprep.mubr.f32.mxu0 %v4526_v6 }
 0x19a   : > { %v2820_v56 = vsel %vm977_vm8, %v2813_v7, %v2815_v28  ;;  %p4456_p3 = por %p4455_p2, %p4454_p1 }
 0x19b   : > { %4332 = vmatpush1.msk.msra.mxu1 %vm292_vm0, %v2820_v56 }
 0x19c   : > { %v2914_v57 = vpop.permute.xlu1 %2913  ;;  %p4457_p5 = pnand %p4456_p3, %p4450_p0 }
 0x19d   : > { %v2811_v58 = vpop.permute.xlu0 %2810 }
 0x19e   : > { %v2819_v27 = vsel %vm977_vm8, %v2809_v30, %v2811_v58 }
 0x19f   : > { %2861 = vmatprep.subr.mxu1 %v2819_v27  ;;  %v845_v27 = vpop.f32.mrf.mxu1 }
 0x1a0   : > { %v2807_v59 = vpop.permute.xlu1 %2806 }
 0x1a1   : > { %v2818_v62 = vsel %vm977_vm8, %v2807_v59, %v2809_v30  ;;  %v2916_v63 = vpop.permute.xlu0 %2915 }
 0x1a2   : > { %v2920_v1 = vsel %vm1078_vm9, %v2914_v57, %v2916_v63  ;;  %2862 = vmatpush1.msra.mxu1 %v2818_v62  ;;  %v4349_v63 = vld [vmem:[%s5561_s1 + $0x18] sm:$0xff] }
 0x1a3   : > { %4335 = vmatprep.subr.msk.mxu0 %vm292_vm0, %v2920_v1  ;;  %4333 = vmatmul.mubr.msk.f32.vlgmr.msra.gmra.mxu1 %vm288_vm1, %v4942_v49 }
 0x1a4   : > { %v2908_v33 = vpop.permute.xlu1 %2907  ;;  %3132 = vmatprep.mubr.f32.mxu1 %v4526_v6 }
 0x1a5   : > { %v2912_v12 = vpop.permute.xlu0 %2911 }
 0x1a6   : > { %v2919_v3 = vsel %vm1078_vm9, %v2912_v12, %v2914_v57  ;;  %v1167_v12 = vlaneseq }
 0x1a7   : > { %4336 = vmatpush1.msk.msra.mxu0 %vm292_vm0, %v2919_v3 }
 0x1a8   : > { %v3052_v4 = vpop.permute.xlu1 %3051 }
 0x1a9   : > { %v2910_v14 = vpop.permute.xlu0 %2909 }
 0x1aa   : > { %v2918_v11 = vsel %vm1078_vm9, %v2908_v33, %v2910_v14 }
 0x1ab   : > { %2960 = vmatprep.subr.mxu0 %v2918_v11 }
 0x1ac   : > { %v2906_v5 = vpop.permute.xlu1 %2905 }
 0x1ad   : > { %v2917_v0 = vsel %vm1078_vm9, %v2906_v5, %v2908_v33  ;;  %v3054_v36 = vpop.permute.xlu0 %3053  ;;  %v1057_v5 = vpop.f32.mrf.mxu1 }
 0x1ae   : > { %v3058_v8 = vsel %vm281_vm2, %v3052_v4, %v3054_v36  ;;  %2961 = vmatpush1.msra.mxu0 %v2917_v0 }
 0x1af   : > { %4339 = vmatprep.subr.msk.mxu1 %vm292_vm0, %v3058_v8  ;;  %4342 = vmatprep.subr.msk.mxu0 %vm292_vm0, %v5101_v9 }
 0x1b0   : > { %v3046_v49 = vpop.permute.xlu1 %3045  ;;  %4337 = vmatmul.mubr.msk.f32.vlgmr.msra.gmra.mxu0 %vm288_vm1, %v4968_v60 }
 0x1b1   : > { %v3050_v10 = vpop.permute.xlu0 %3049  ;;  %4343 = vmatpush1.msk.msra.mxu0 %vm292_vm0, %v5123_v24  ;;  %3210 = vmatprep.mubr.f32.mxu0 %v4526_v6 }
 0x1b2   : > { %v3057_v16 = vsel %vm281_vm2, %v3050_v10, %v3052_v4  ;;  %3176 = vmatprep.subr.mxu0 %v5062_v51  ;;  %v363_v51 = vpop.f32.mrf.mxu0 }
 0x1b3   : > { %4340 = vmatpush1.msk.msra.mxu1 %vm292_vm0, %v3057_v16  ;;  %3177 = vmatpush1.msra.mxu0 %v4935_v45  ;;  %v442_v34 = vadd.f32 %v441_v23, %v363_v51  ;;  %v1059_v16 = vpop.f32.mrf.mxu1 }
 0x1b4   : > { %v3044_v9 = vpop.permute.xlu1 %3043  ;;  %4344 = vmatmul.mubr.msk.f32.vlgmr.msra.gmra.mxu0 %vm288_vm1, %v3033_v13  ;;  %v365_v22 = vpop.f32.mrf.mxu0 }
 0x1b5   : > { %v3055_v60 = vsel %vm281_vm2, %v3044_v9, %v3046_v49  ;;  %v3048_v24 = vpop.permute.xlu0 %3047  ;;  %3406 = vmatprep.mubr.f32.mxu0 %v4526_v6  ;;  %v444_v35 = vadd.f32 %v443_v29, %v365_v22 }
 0x1b6   : > { %v3056_v17 = vsel %vm281_vm2, %v3046_v49, %v3048_v24  ;;  %v540_v31 = vpop.f32.mrf.mxu0  ;;  %v1168_v49 = vshrl.u32 %v1167_v12, 7 }
 0x1b7   : > { %3098 = vmatprep.subr.mxu1 %v3056_v17  ;;  %v545_v61 = vadd.f32 %v540_v31, %v442_v34 }
 0x1b8   : > { %3099 = vmatpush1.msra.mxu1 %v3055_v60  ;;  %v3229_v20 = vpop.permute.xlu1 %3228  ;;  %v542_v39 = vpop.f32.mrf.mxu0  ;;  %v5357_v51 = vsub.s32 1, %v1168_v49 }
 0x1b9   : > { %v3227_v21 = vpop.permute.xlu0 %3226  ;;  %4341 = vmatmul.mubr.msk.f32.vlgmr.msra.gmra.mxu1 %vm288_vm1, %v4338_v18  ;;  %v546_v44 = vadd.f32 %v542_v39, %v444_v35  ;;  %v646_v54 = vadd.f32 %v641_v40, %v545_v61  ;;  %v5355_v18 = vsub.s32 0, %v1168_v49 }
 0x1ba   : > { %v3233_v45 = vsel %vm460_vm3, %v3227_v21, %v3229_v20  ;;  %3307 = vmatprep.mubr.f32.mxu1 %v4526_v6  ;;  %v742_v53 = vpop.f32.mrf.mxu0 }
 0x1bb   : > { %4346 = vmatprep.subr.msk.mxu1 %vm292_vm0, %v3233_v45  ;;  %v647_v41 = vadd.f32 %v643_v52, %v546_v44  ;;  %v747_v7 = vadd.f32 %v742_v53, %v646_v54 }
 0x1bc   : > { %v3221_v25 = vpop.permute.xlu1 %3220  ;;  %v744_v2 = vpop.f32.mrf.mxu0 }
 0x1bd   : > { %v3225_v26 = vpop.permute.xlu0 %3224  ;;  %v748_v56 = vadd.f32 %v744_v2, %v647_v41  ;;  %v848_v1 = vadd.f32 %v843_v15, %v747_v7 }
 0x1be   : > { %v3232_v48 = vsel %vm460_vm3, %v3225_v26, %v3227_v21  ;;  %v956_v59 = vpop.f32.mrf.mxu0  ;;  %v1165_v21 = vld [vmem:[%s5564_s4] sm:$0x3] }
 0x1bf   : > { %4347 = vmatpush1.msk.msra.mxu1 %vm292_vm0, %v3232_v48  ;;  %v849_v33 = vadd.f32 %v845_v27, %v748_v56  ;;  %v961_v36 = vadd.f32 %v956_v59, %v848_v1  ;;  %v1170_v48 = vrot.slane %v1165_v21, %v5355_v18  ;;  %v1174_v31 = vrot.slane %v1165_v21, %v5357_v51  ;;  %v4361_v59 = vld [vmem:[%s5561_s1 + $0x30] sm:$0xff]  ;;  %v4365_v21 = vld [vmem:[%s5561_s1 + $0x38] sm:$0xff] }
 0x1c0   : > { %v3326_v32 = vpop.permute.xlu1 %3325  ;;  %v958_v11 = vpop.f32.mrf.mxu0 }
 0x1c1   : > { %v3223_v37 = vpop.permute.xlu0 %3222  ;;  %v962_v8 = vadd.f32 %v958_v11, %v849_v33  ;;  %v1062_v24 = vadd.f32 %v1057_v5, %v961_v36 }
 0x1c2   : > { %v3231_v38 = vsel %vm460_vm3, %v3221_v25, %v3223_v37  ;;  %v1158_v9 = vpop.f32.mrf.mxu0 }
 0x1c3   : > { %3273 = vmatprep.subr.mxu1 %v3231_v38  ;;  %v1063_v17 = vadd.f32 %v1059_v16, %v962_v8  ;;  %v5366_v26 = vadd.f32 %v1158_v9, %v1062_v24 }
 0x1c4   : > { %v3219_v42 = vpop.permute.xlu1 %3218  ;;  %v1160_v22 = vpop.f32.mrf.mxu0 }
 0x1c5   : > { %v3230_v46 = vsel %vm460_vm3, %v3219_v42, %v3221_v25  ;;  %v3328_v47 = vpop.permute.xlu0 %3327  ;;  %v4353_v25 = vld [vmem:[%s5561_s1 + $0x20] sm:$0xff]  ;;  %v5369_v29 = vadd.f32 %v1160_v22, %v1063_v17  ;;  %v1177_v38 = vmul.f32 %v1170_v48, %v5366_v26 }
 0x1c6   : > { %v3332_v50 = vsel %vm561_vm4, %v3326_v32, %v3328_v47  ;;  %3274 = vmatpush1.msra.mxu1 %v3230_v46  ;;  %v1374_v56 = vpop.f32.mrf.mxu0 }
 0x1c7   : > { %4350 = vmatprep.subr.msk.mxu0 %vm292_vm0, %v3332_v50  ;;  %4348 = vmatmul.mubr.msk.f32.vlgmr.msra.gmra.mxu1 %vm288_vm1, %v4345_v43  ;;  %v1178_v39 = vmul.f32 %v1174_v31, %v5369_v29  ;;  %v4357_v50 = vld [vmem:[%s5561_s1 + $0x28] sm:$0xff] }
 0x1c8   : > { %v3320_v28 = vpop.permute.xlu1 %3319  ;;  %3505 = vmatprep.mubr.f32.mxu1 %v4526_v6  ;;  %v1376_v12 = vpop.f32.mrf.mxu0 }
 0x1c9   : > { %v3324_v19 = vpop.permute.xlu0 %3323  ;;  %v1179_v61 = vadd.f32 %v1178_v39, %v1177_v38 }
 0x1ca   : > { %v3331_v55 = vsel %vm561_vm4, %v3324_v19, %v3326_v32 }
 0x1cb   : > { %4351 = vmatpush1.msk.msra.mxu0 %vm292_vm0, %v3331_v55  ;;  %1180 = vadd.xlane.f32.xlu0 %v1179_v61  ;;  %v1296_v55 = vpop.f32.mrf.mxu1 }
 0x1cc   : > { %v3425_v30 = vpop.permute.xlu1 %3424  ;;  %v1375_v1 = vadd.f32 %v1374_v56, %v1296_v55 }
 0x1cd   : > { %v3322_v57 = vpop.permute.xlu0 %3321  ;;  %v1298_v7 = vpop.f32.mrf.mxu1 }
 0x1ce   : > { %v3330_v58 = vsel %vm561_vm4, %v3320_v28, %v3322_v57  ;;  %v1183_v57 = vmul.f32 %v1177_v38, %v1177_v38 }
 0x1cf   : > { %3372 = vmatprep.subr.mxu0 %v3330_v58  ;;  %v1184_v58 = vmul.f32 %v1178_v39, %v1178_v39 }
 0x1d0   : > { %v3318_v62 = vpop.permute.xlu1 %3317 }
 0x1d1   : > { %v3329_v3 = vsel %vm561_vm4, %v3318_v62, %v3320_v28  ;;  %v3427_v4 = vpop.permute.xlu0 %3426 }
 0x1d2   : > { %v3431_v14 = vsel %vm662_vm5, %v3425_v30, %v3427_v4  ;;  %3373 = vmatpush1.msra.mxu0 %v3329_v3  ;;  %v1471_v3 = vpop.f32.mrf.mxu1  ;;  %v1377_v4 = vadd.f32 %v1376_v12, %v1298_v7 }
 0x1d3   : > { %4354 = vmatprep.subr.msk.mxu1 %vm292_vm0, %v3431_v14  ;;  %4352 = vmatmul.mubr.msk.f32.vlgmr.msra.gmra.mxu0 %vm288_vm1, %v4349_v63  ;;  %v1185_v14 = vadd.f32 %v1184_v58, %v1183_v57 }
 0x1d4   : > { %v3419_v0 = vpop.permute.xlu1 %3418  ;;  %3604 = vmatprep.mubr.f32.mxu0 %v4526_v6  ;;  %v1473_v8 = vpop.f32.mrf.mxu1 }
 0x1d5   : > { %v3423_v10 = vpop.permute.xlu0 %3422  ;;  %1186 = vadd.xlane.f32.xlu0 %v1185_v14  ;;  %v1570_v49 = vpop.f32.mrf.mxu0 }
 0x1d6   : > { %v3430_v13 = vsel %vm662_vm5, %v3423_v10, %v3425_v30  ;;  %v1477_v10 = vadd.f32 %v1473_v8, %v1377_v4 }
 0x1d7   : > { %4355 = vmatpush1.msk.msra.mxu1 %vm292_vm0, %v3430_v13  ;;  %v1572_v24 = vpop.f32.mrf.mxu0 }
 0x1d8   : > { %v3524_v60 = vpop.permute.xlu1 %3523 }
 0x1d9   : > { %v3421_v20 = vpop.permute.xlu0 %3420 }
 0x1da   : > { %v3429_v45 = vsel %vm662_vm5, %v3419_v0, %v3421_v20  ;;  %v1576_v20 = vadd.f32 %v1572_v24, %v1477_v10 }
 0x1db   : > { %3471 = vmatprep.subr.mxu1 %v3429_v45 }
 0x1dc   : > { %v3417_v23 = vpop.permute.xlu1 %3416 }
 0x1dd   : > { %v3428_v32 = vsel %vm662_vm5, %v3417_v23, %v3419_v0  ;;  %v3526_v34 = vpop.permute.xlu0 %3525  ;;  %v1476_v0 = vadd.f32 %v1471_v3, %v1375_v1 }
 0x1de   : > { %v3530_v35 = vsel %vm763_vm6, %v3524_v60, %v3526_v34  ;;  %3472 = vmatpush1.msra.mxu1 %v3428_v32 }
 0x1df   : > { %4358 = vmatprep.subr.msk.mxu0 %vm292_vm0, %v3530_v35  ;;  %4356 = vmatmul.mubr.msk.f32.vlgmr.msra.gmra.mxu1 %vm288_vm1, %v4353_v25  ;;  %v1575_v9 = vadd.f32 %v1570_v49, %v1476_v0 }
 0x1e0   : > { %v3518_v37 = vpop.permute.xlu1 %3517  ;;  %3715 = vmatprep.mubr.f32.mxu1 %v4526_v6  ;;  %v1669_v17 = vpop.f32.mrf.mxu1 }
 0x1e1   : > { %v3522_v40 = vpop.permute.xlu0 %3521  ;;  %v1674_v23 = vadd.f32 %v1669_v17, %v1575_v9 }
 0x1e2   : > { %v3529_v42 = vsel %vm763_vm6, %v3522_v40, %v3524_v60  ;;  %v1671_v48 = vpop.f32.mrf.mxu1 }
 0x1e3   : > { %4359 = vmatpush1.msk.msra.mxu0 %vm292_vm0, %v3529_v42  ;;  %v1675_v32 = vadd.f32 %v1671_v48, %v1576_v20 }
 0x1e4   : > { %v3635_v43 = vpop.permute.xlu1 %3634 }
 0x1e5   : > { %v3520_v44 = vpop.permute.xlu0 %3519 }
 0x1e6   : > { %v3528_v46 = vsel %vm763_vm6, %v3518_v37, %v3520_v44 }
 0x1e7   : > { %3570 = vmatprep.subr.mxu0 %v3528_v46 }
 0x1e8   : > { %v3516_v47 = vpop.permute.xlu1 %3515 }
 0x1e9   : > { %v3527_v52 = vsel %vm763_vm6, %v3516_v47, %v3518_v37  ;;  %v3637_v53 = vpop.permute.xlu0 %3636 }
 0x1ea   : > { %v3641_v28 = vsel %vm876_vm7, %v3635_v43, %v3637_v53  ;;  %3571 = vmatpush1.msra.mxu0 %v3527_v52 }
 0x1eb   : > { %4362 = vmatprep.subr.msk.mxu1 %vm292_vm0, %v3641_v28  ;;  %4360 = vmatmul.mubr.msk.f32.vlgmr.msra.gmra.mxu0 %vm288_vm1, %v4357_v50  ;;  %v2084_v28 = vld [vmem:[%s5564_s4 + $0x2] sm:$0x3] }
 0x1ec   : > { %v3629_v54 = vpop.permute.xlu1 %3628  ;;  %3814 = vmatprep.mubr.f32.mxu0 %v4526_v6  ;;  %v1768_v31 = vpop.f32.mrf.mxu0  ;;  %v2093_v7 = vrot.slane %v2084_v28, %v5357_v51 }
 0x1ed   : > { %v3633_v41 = vpop.permute.xlu0 %3632  ;;  %v1773_v37 = vadd.f32 %v1768_v31, %v1674_v23 }
 0x1ee   : > { %v3640_v19 = vsel %vm876_vm7, %v3633_v41, %v3635_v43  ;;  %v1770_v39 = vpop.f32.mrf.mxu0 }
 0x1ef   : > { %4363 = vmatpush1.msk.msra.mxu1 %vm292_vm0, %v3640_v19  ;;  %v1774_v42 = vadd.f32 %v1770_v39, %v1675_v32 }
 0x1f0   : > { %v3734_v2 = vpop.permute.xlu1 %3733 }
 0x1f1   : > { %v3631_v15 = vpop.permute.xlu0 %3630 }
 0x1f2   : > { %v3639_v30 = vsel %vm876_vm7, %v3629_v54, %v3631_v15 }
 0x1f3   : > { %3681 = vmatprep.subr.mxu1 %v3639_v30 }
 0x1f4   : > { %v3627_v27 = vpop.permute.xlu1 %3626 }
 0x1f5   : > { %v3638_v62 = vsel %vm876_vm7, %v3627_v27, %v3629_v54  ;;  %v3736_v63 = vpop.permute.xlu0 %3735  ;;  %v4446_v54 = vld [vmem:[%s5561_s1 + $0x40] sm:$0xff] }
 0x1f6   : > { %v3740_v33 = vsel %vm977_vm8, %v3734_v2, %v3736_v63  ;;  %3682 = vmatpush1.msra.mxu1 %v3638_v62 }
 0x1f7   : > { %4366 = vmatprep.subr.msk.mxu0 %vm292_vm0, %v3740_v33  ;;  %4364 = vmatmul.mubr.msk.f32.vlgmr.msra.gmra.mxu1 %vm288_vm1, %v4361_v59 }
 0x1f8   : > { %v3728_v11 = vpop.permute.xlu1 %3727  ;;  %3913 = vmatprep.mubr.f32.mxu1 %v4526_v6  ;;  %v1879_v40 = vpop.f32.mrf.mxu1 }
 0x1f9   : > { %v3732_v5 = vpop.permute.xlu0 %3731  ;;  %v1884_v46 = vadd.f32 %v1879_v40, %v1773_v37 }
 0x1fa   : > { %v3739_v36 = vsel %vm977_vm8, %v3732_v5, %v3734_v2  ;;  %v1881_v50 = vpop.f32.mrf.mxu1  ;;  %v2089_v2 = vrot.slane %v2084_v28, %v5355_v18 }
 0x1fb   : > { %4367 = vmatpush1.msk.msra.mxu0 %vm292_vm0, %v3739_v36  ;;  %v1885_v53 = vadd.f32 %v1881_v50, %v1774_v42 }
 0x1fc   : > { %v3833_v13 = vpop.permute.xlu1 %3832 }
 0x1fd   : > { %v3730_v16 = vpop.permute.xlu0 %3729 }
 0x1fe   : > { %v3738_v60 = vsel %vm977_vm8, %v3728_v11, %v3730_v16 }
 0x1ff   : > { %3780 = vmatprep.subr.mxu0 %v3738_v60 }
 0x200   : > { %v3726_v6 = vpop.permute.xlu1 %3725 }
 0x201   : > { %v3737_v45 = vsel %vm977_vm8, %v3726_v6, %v3728_v11  ;;  %v3835_v22 = vpop.permute.xlu0 %3834 }
 0x202   : > { %v3839_v25 = vsel %vm1078_vm9, %v3833_v13, %v3835_v22  ;;  %3781 = vmatpush1.msra.mxu0 %v3737_v45 }
 0x203   : > { %4370 = vmatprep.subr.msk.mxu1 %vm292_vm0, %v3839_v25  ;;  %4368 = vmatmul.mubr.msk.f32.vlgmr.msra.gmra.mxu0 %vm288_vm1, %v4365_v21 }
 0x204   : > { %v3827_v34 = vpop.permute.xlu1 %3826  ;;  %v1978_v52 = vpop.f32.mrf.mxu0 }
 0x205   : > { %v3831_v35 = vpop.permute.xlu0 %3830  ;;  %v1983_v41 = vadd.f32 %v1978_v52, %v1884_v46 }
 0x206   : > { %v3838_v38 = vsel %vm1078_vm9, %v3831_v35, %v3833_v13  ;;  %v1980_v19 = vpop.f32.mrf.mxu0 }
 0x207   : > { %4371 = vmatpush1.msk.msra.mxu1 %vm292_vm0, %v3838_v38  ;;  %v1984_v55 = vadd.f32 %v1980_v19, %v1885_v53 }
 0x208   : > { %v3825_v43 = vpop.permute.xlu1 %3824 }
 0x209   : > { %v3836_v61 = vsel %vm1078_vm9, %v3825_v43, %v3827_v34  ;;  %v3829_v44 = vpop.permute.xlu0 %3828 }
 0x20a   : > { %v3837_v47 = vsel %vm1078_vm9, %v3827_v34, %v3829_v44  ;;  %v3003_v34 = vld [vmem:[%s5564_s4 + $0x4] sm:$0x3] }
 0x20b   : > { %3879 = vmatprep.subr.mxu1 %v3837_v47  ;;  %v3008_v38 = vrot.slane %v3003_v34, %v5355_v18  ;;  %v3012_v42 = vrot.slane %v3003_v34, %v5357_v51 }
 0x20c   : > { %3880 = vmatpush1.msra.mxu1 %v3836_v61 }
 0x20d   : > { %4372 = vmatmul.mubr.msk.f32.vlgmr.msra.gmra.mxu1 %vm288_vm1, %v4446_v54 }
 0x210   : > { %v2077_v15 = vpop.f32.mrf.mxu1 }
 0x211   : > { %v5423_v30 = vadd.f32 %v2077_v15, %v1983_v41 }
 0x212   : > { %v2079_v56 = vpop.f32.mrf.mxu1 }
 0x213   : > { %v2096_v57 = vmul.f32 %v2089_v2, %v5423_v30  ;;  %v5427_v58 = vadd.f32 %v2079_v56, %v1984_v55 }
 0x215   : > { %v2102_v27 = vmul.f32 %v2096_v57, %v2096_v57  ;;  %v2097_v59 = vmul.f32 %v2093_v7, %v5427_v58  ;;  %v2293_v3 = vpop.f32.mrf.mxu1 }
 0x217   : > { %v2103_v62 = vmul.f32 %v2097_v59, %v2097_v59  ;;  %v2098_v63 = vadd.f32 %v2097_v59, %v2096_v57  ;;  %v2295_v4 = vpop.f32.mrf.mxu1 }
 0x219   : > { %2099 = vadd.xlane.f32.xlu1 %v2098_v63  ;;  %v2104_v1 = vadd.f32 %v2103_v62, %v2102_v27  ;;  %v2215_v33 = vpop.f32.mrf.mxu0 }
 0x21a   : > { %v2294_v11 = vadd.f32 %v2293_v3, %v2215_v33 }
 0x21b   : > { %2105 = vadd.xlane.f32.xlu0 %v2104_v1  ;;  %v2217_v12 = vpop.f32.mrf.mxu0 }
 0x21c   : > { %v2296_v5 = vadd.f32 %v2295_v4, %v2217_v12 }
 0x228   : > { %v2390_v14 = vpop.f32.mrf.mxu0 }
 0x229   : > { %v2395_v8 = vadd.f32 %v2390_v14, %v2294_v11 }
 0x22a   : > { %v2392_v0 = vpop.f32.mrf.mxu0 }
 0x22b   : > { %v2396_v49 = vadd.f32 %v2392_v0, %v2296_v5 }
 0x234   : > { %v2489_v36 = vpop.f32.mrf.mxu1 }
 0x235   : > { %v2494_v16 = vadd.f32 %v2489_v36, %v2395_v8 }
 0x236   : > { %v2491_v10 = vpop.f32.mrf.mxu1 }
 0x237   : > { %v2495_v9 = vadd.f32 %v2491_v10, %v2396_v49  ;;  %v3922_v10 = vld [vmem:[%s5564_s4 + $0x6] sm:$0x3] }
 0x240   : > { %v2588_v13 = vpop.f32.mrf.mxu0 }
 0x241   : > { %v2593_v17 = vadd.f32 %v2588_v13, %v2494_v16 }
 0x242   : > { %v2590_v60 = vpop.f32.mrf.mxu0 }
 0x243   : > { %v2594_v20 = vadd.f32 %v2590_v60, %v2495_v9  ;;  %v3927_v60 = vrot.slane %v3922_v10, %v5355_v18 }
 0x24c   : > { %v2687_v24 = vpop.f32.mrf.mxu1 }
 0x24d   : > { %v2692_v45 = vadd.f32 %v2687_v24, %v2593_v17 }
 0x24e   : > { %v2689_v6 = vpop.f32.mrf.mxu1 }
 0x24f   : > { %v2693_v22 = vadd.f32 %v2689_v6, %v2594_v20  ;;  %v3931_v6 = vrot.slane %v3922_v10, %v5357_v51 }
 0x254   : > { %v1181_v34 = vpop.xlane.xlu0 %1180 }
 0x258   : > { %v2798_v21 = vpop.f32.mrf.mxu0 }
 0x259   : > { %v2803_v48 = vadd.f32 %v2798_v21, %v2692_v45 }
 0x25a   : > { %v2800_v23 = vpop.f32.mrf.mxu0 }
 0x25b   : > { %v2804_v31 = vadd.f32 %v2800_v23, %v2693_v22 }
 0x263   : > { %v2897_v25 = vpop.f32.mrf.mxu1 }
 0x264   : > { %v2902_v35 = vadd.f32 %v2897_v25, %v2803_v48 }
 0x265   : > { %v2899_v32 = vpop.f32.mrf.mxu1 }
 0x266   : > { %v2903_v37 = vadd.f32 %v2899_v32, %v2804_v31 }
 0x270   : > { %v2996_v39 = vpop.f32.mrf.mxu0 }
 0x271   : > { %v5434_v40 = vadd.f32 %v2996_v39, %v2902_v35  ;;  %v1187_v35 = vpop.xlane.xlu0 %1186 }
 0x272   : > { %v2998_v43 = vpop.f32.mrf.mxu0 }
 0x273   : > { %v3015_v61 = vmul.f32 %v3008_v38, %v5434_v40  ;;  %v5438_v44 = vadd.f32 %v2998_v43, %v2903_v37 }
 0x274   : > { %v3212_v41 = vpop.f32.mrf.mxu0 }
 0x275   : > { %v3021_v46 = vmul.f32 %v3015_v61, %v3015_v61  ;;  %v3016_v47 = vmul.f32 %v3012_v42, %v5438_v44 }
 0x276   : > { %v3214_v19 = vpop.f32.mrf.mxu0 }
 0x277   : > { %v3022_v50 = vmul.f32 %v3016_v47, %v3016_v47  ;;  %v3017_v52 = vadd.f32 %v3016_v47, %v3015_v61 }
 0x279   : > { %3018 = vadd.xlane.f32.xlu1 %v3017_v52  ;;  %v3023_v53 = vadd.f32 %v3022_v50, %v3021_v46  ;;  %v3134_v28 = vpop.f32.mrf.mxu1 }
 0x27a   : > { %v3213_v2 = vadd.f32 %v3212_v41, %v3134_v28 }
 0x27b   : > { %3024 = vadd.xlane.f32.xlu0 %v3023_v53  ;;  %v3136_v54 = vpop.f32.mrf.mxu1 }
 0x27c   : > { %v3215_v15 = vadd.f32 %v3214_v19, %v3136_v54 }
 0x287   : > { %v3309_v55 = vpop.f32.mrf.mxu1 }
 0x288   : > { %v3314_v57 = vadd.f32 %v3309_v55, %v3213_v2 }
 0x289   : > { %v3311_v7 = vpop.f32.mrf.mxu1 }
 0x28a   : > { %v3315_v27 = vadd.f32 %v3311_v7, %v3215_v15  ;;  %v3961_v7 = vld [vmem:[%s5562_s2] sm:$0x3] }
 0x293   : > { %v3408_v56 = vpop.f32.mrf.mxu0 }
 0x294   : > { %v3413_v63 = vadd.f32 %v3408_v56, %v3314_v57  ;;  %v4003_v56 = vld [vmem:[%s5562_s2 + $0x2] sm:$0x3]  ;;  %v3975_v57 = vld [vmem:[%s5563_s3] sm:$0x3] }
 0x295   : > { %v3410_v59 = vpop.f32.mrf.mxu0 }
 0x296   : > { %v3414_v1 = vadd.f32 %v3410_v59, %v3315_v27  ;;  %v4045_v27 = vld [vmem:[%s5562_s2 + $0x4] sm:$0x3]  ;;  %v4017_v59 = vld [vmem:[%s5563_s3 + $0x2] sm:$0x3] }
 0x29f   : > { %v3507_v62 = vpop.f32.mrf.mxu1 }
 0x2a0   : > { %v3512_v3 = vadd.f32 %v3507_v62, %v3413_v63  ;;  %v4059_v62 = vld [vmem:[%s5563_s3 + $0x4] sm:$0x3]  ;;  %v3966_v63 = vrot.slane %v3961_v7, %v5355_v18 }
 0x2a1   : > { %v3509_v33 = vpop.f32.mrf.mxu1  ;;  %v4068_v10 = vrot.slane %v4059_v62, %v5357_v51 }
 0x2a2   : > { %v3513_v4 = vadd.f32 %v3509_v33, %v3414_v1  ;;  %v2100_v37 = vpop.xlane.xlu1 %2099  ;;  %v3970_v1 = vrot.slane %v3961_v7, %v5357_v51  ;;  %v4008_v33 = vrot.slane %v4003_v56, %v5355_v18 }
 0x2a3   : > { %v2101_v39 = vadd.f32 %v2100_v37, %v1181_v34 }
 0x2a4   : > { %v2106_v38 = vpop.xlane.xlu0 %2105 }
 0x2a5   : > { %v2107_v43 = vadd.f32 %v2106_v38, %v1187_v35 }
 0x2ab   : > { %v3606_v12 = vpop.f32.mrf.mxu0 }
 0x2ac   : > { %v3611_v5 = vadd.f32 %v3606_v12, %v3512_v3  ;;  %v4012_v12 = vrot.slane %v4003_v56, %v5357_v51  ;;  %v4087_v3 = vld [vmem:[%s5562_s2 + $0x6] sm:$0x3] }
 0x2ad   : > { %v3608_v14 = vpop.f32.mrf.mxu0 }
 0x2ae   : > { %v3612_v0 = vadd.f32 %v3608_v14, %v3513_v4  ;;  %v4101_v4 = vld [vmem:[%s5563_s3 + $0x6] sm:$0x3]  ;;  %v3980_v14 = vrot.slane %v3975_v57, %v5355_v18 }
 0x2b7   : > { %v3717_v11 = vpop.f32.mrf.mxu1 }
 0x2b8   : > { %v3722_v49 = vadd.f32 %v3717_v11, %v3611_v5  ;;  %v3984_v11 = vrot.slane %v3975_v57, %v5357_v51  ;;  %v4050_v5 = vrot.slane %v4045_v27, %v5355_v18 }
 0x2b9   : > { %v3719_v36 = vpop.f32.mrf.mxu1 }
 0x2ba   : > { %v3723_v13 = vadd.f32 %v3719_v36, %v3612_v0  ;;  %v4054_v0 = vrot.slane %v4045_v27, %v5357_v51  ;;  %v4022_v36 = vrot.slane %v4017_v59, %v5355_v18 }
 0x2c3   : > { %v3816_v8 = vpop.f32.mrf.mxu0 }
 0x2c4   : > { %v3821_v9 = vadd.f32 %v3816_v8, %v3722_v49  ;;  %v4026_v8 = vrot.slane %v4017_v59, %v5357_v51  ;;  %v4064_v49 = vrot.slane %v4059_v62, %v5355_v18 }
 0x2c5   : > { %v3818_v16 = vpop.f32.mrf.mxu0 }
 0x2c6   : > { %v3822_v17 = vadd.f32 %v3818_v16, %v3723_v13  ;;  %v4092_v13 = vrot.slane %v4087_v3, %v5355_v18  ;;  %v4096_v16 = vrot.slane %v4087_v3, %v5357_v51 }
 0x2cd   : > { %v3915_v24 = vpop.f32.mrf.mxu1 }
 0x2ce   : > { %v5445_v20 = vadd.f32 %v3915_v24, %v3821_v9  ;;  %v4106_v9 = vrot.slane %v4101_v4, %v5355_v18 }
 0x2cf   : > { %v3917_v21 = vpop.f32.mrf.mxu1 }
 0x2d0   : > { %v3934_v45 = vmul.f32 %v3927_v60, %v5445_v20  ;;  %v5449_v22 = vadd.f32 %v3917_v21, %v3822_v17  ;;  %v4110_v60 = vrot.slane %v4101_v4, %v5357_v51 }
 0x2d2   : > { %v3935_v23 = vmul.f32 %v3931_v6, %v5449_v22  ;;  %v3940_v25 = vmul.f32 %v3934_v45, %v3934_v45 }
 0x2d4   : > { %v3941_v48 = vmul.f32 %v3935_v23, %v3935_v23  ;;  %v3936_v31 = vadd.f32 %v3935_v23, %v3934_v45 }
 0x2d6   : > { %3937 = vadd.xlane.f32.xlu1 %v3936_v31  ;;  %v3942_v32 = vadd.f32 %v3941_v48, %v3940_v25 }
 0x2d8   : > { %3943 = vadd.xlane.f32.xlu0 %v3942_v32 }
 0x302   : > { %v3019_v42 = vpop.xlane.xlu1 %3018 }
 0x303   : > { %v3020_v46 = vadd.f32 %v3019_v42, %v2101_v39 }
 0x304   : > { %v3025_v61 = vpop.xlane.xlu0 %3024 }
 0x305   : > { %v3026_v50 = vadd.f32 %v3025_v61, %v2107_v43 }
 0x35f   : > { %v3938_v47 = vpop.xlane.xlu1 %3937 }
 0x360   : > { %v3939_v52 = vadd.f32 %v3938_v47, %v3020_v46 }
 0x361   : > { %v3944_v53 = vpop.xlane.xlu0 %3943 }
 0x362   : > { %v3948_v28 = vmul.f32 0.001953125, %v3939_v52  ;;  %v3945_v54 = vadd.f32 %v3944_v53, %v3026_v50 }
 0x364   : > { %v3950_v41 = vmul.f32 %v3948_v28, %v3948_v28  ;;  %v3949_v19 = vmul.f32 0.001953125, %v3945_v54  ;;  %v3957_v24 = vsub.f32 %v5366_v26, %v3948_v28  ;;  %v3958_v17 = vsub.f32 %v5369_v29, %v3948_v28 }
 0x365   : > { %v3999_v6 = vsub.f32 %v5423_v30, %v3948_v28  ;;  %v4000_v21 = vsub.f32 %v5427_v58, %v3948_v28  ;;  %v4041_v23 = vsub.f32 %v5434_v40, %v3948_v28  ;;  %v4042_v25 = vsub.f32 %v5438_v44, %v3948_v28 }
 0x366   : > { %v3951_v55 = vsub.f32 %v3949_v19, %v3950_v41  ;;  %v4083_v48 = vsub.f32 %v5445_v20, %v3948_v28  ;;  %v4084_v18 = vsub.f32 %v5449_v22, %v3948_v28 }
 0x368   : > { %v3952_v2 = vmax.f32 %v3951_v55, 0.0 }
 0x36a   : > { %v3953_v15 = vadd.f32 1e-05, %v3952_v2 }
 0x36c   : > { %4444 = vrsqrt.f32 %v3953_v15 }
 0x379   : > { %v4445_v45 = vpop.eup %4444 }
 0x37a   : > { %v3959_v51 = vmul.f32 %v4445_v45, %v3957_v24  ;;  %v3960_v31 = vmul.f32 %v4445_v45, %v3958_v17  ;;  %v4001_v26 = vmul.f32 %v4445_v45, %v3999_v6  ;;  %v4002_v32 = vmul.f32 %v4445_v45, %v4000_v21 }
 0x37b   : > { %v4043_v29 = vmul.f32 %v4445_v45, %v4041_v23  ;;  %v4044_v34 = vmul.f32 %v4445_v45, %v4042_v25  ;;  %v4085_v30 = vmul.f32 %v4445_v45, %v4083_v48  ;;  %v4086_v35 = vmul.f32 %v4445_v45, %v4084_v18 }
 0x37c   : > { %v3973_v58 = vmul.f32 %v3966_v63, %v3959_v51  ;;  %v3974_v37 = vmul.f32 %v3970_v1, %v3960_v31  ;;  %v4015_v40 = vmul.f32 %v4008_v33, %v4001_v26  ;;  %v4016_v38 = vmul.f32 %v4012_v12, %v4002_v32 }
 0x37d   : > { %v4057_v44 = vmul.f32 %v4050_v5, %v4043_v29  ;;  %v4058_v39 = vmul.f32 %v4054_v0, %v4044_v34  ;;  %v4099_v20 = vmul.f32 %v4092_v13, %v4085_v30  ;;  %v4100_v42 = vmul.f32 %v4096_v16, %v4086_v35 }
 0x37e   : > { %v3987_v22 = vadd.f32 %v3980_v14, %v3973_v58  ;;  %v3988_v43 = vadd.f32 %v3984_v11, %v3974_v37  ;;  %v4029_v61 = vadd.f32 %v4022_v36, %v4015_v40  ;;  %v4030_v46 = vadd.f32 %v4026_v8, %v4016_v38 }
 0x37f   : > { %v4071_v47 = vadd.f32 %v4064_v49, %v4057_v44  ;;  %v4072_v50 = vadd.f32 %v4068_v10, %v4058_v39  ;;  %v4113_v52 = vadd.f32 %v4106_v9, %v4099_v20  ;;  %v4114_v53 = vadd.f32 %v4110_v60, %v4100_v42 }
 0x380   : > { %vm3989_vm10 = vcmp.ge.f32.partialorder %v3987_v22, 0.0  ;;  %vm3990_vm11 = vcmp.ge.f32.partialorder %v3988_v43, 0.0  ;;  %v3991_v28 = vmul.f32 0.1, %v3987_v22  ;;  %v3992_v54 = vmul.f32 0.1, %v3988_v43 }
 0x381   : > { %vm4031_vm12 = vcmp.ge.f32.partialorder %v4029_v61, 0.0  ;;  %vm4032_vm13 = vcmp.ge.f32.partialorder %v4030_v46, 0.0  ;;  %v4033_v41 = vmul.f32 0.1, %v4029_v61  ;;  %v4034_v19 = vmul.f32 0.1, %v4030_v46 }
 0x382   : > { %v3993_v55 = vsel %vm3989_vm10, %v3987_v22, %v3991_v28  ;;  %v3994_v2 = vsel %vm3990_vm11, %v3988_v43, %v3992_v54  ;;  %vm4073_vm14 = vcmp.ge.f32.partialorder %v4071_v47, 0.0  ;;  %vm4074_vm15 = vcmp.ge.f32.partialorder %v4072_v50, 0.0 }
 0x383   : > { %3995 = vst [vmem:[%s244_s11] sm:$0xff] %v3993_v55  ;;  %3996 = vst [vmem:[%s244_s11 + $0x8] sm:$0xff] %v3994_v2  ;;  %v4035_v15 = vsel %vm4031_vm12, %v4029_v61, %v4033_v41  ;;  %v4036_v7 = vsel %vm4032_vm13, %v4030_v46, %v4034_v19  ;;  %v4075_v56 = vmul.f32 0.1, %v4071_v47  ;;  %v4076_v57 = vmul.f32 0.1, %v4072_v50 }
 0x384   : > { %4037 = vst [vmem:[%s244_s11 + $0x10] sm:$0xff] %v4035_v15  ;;  %4038 = vst [vmem:[%s244_s11 + $0x18] sm:$0xff] %v4036_v7  ;;  %vm4115_vm0 = vcmp.ge.f32.partialorder %v4113_v52, 0.0  ;;  %vm4116_vm1 = vcmp.ge.f32.partialorder %v4114_v53, 0.0  ;;  %v4117_v27 = vmul.f32 0.1, %v4113_v52 }
 0x385   : > { %v4118_v59 = vmul.f32 0.1, %v4114_v53  ;;  %v4077_v62 = vsel %vm4073_vm14, %v4071_v47, %v4075_v56  ;;  %v4078_v63 = vsel %vm4074_vm15, %v4072_v50, %v4076_v57 }
 0x386   : > { %4079 = vst [vmem:[%s244_s11 + $0x20] sm:$0xff] %v4077_v62  ;;  %4080 = vst [vmem:[%s244_s11 + $0x28] sm:$0xff] %v4078_v63  ;;  %v4119_v1 = vsel %vm4115_vm0, %v4113_v52, %v4117_v27 }
 0x387   : > { %v4120_v33 = vsel %vm4116_vm1, %v4114_v53, %v4118_v59  ;;  %4121 = vst [vmem:[%s244_s11 + $0x30] sm:$0xff] %v4119_v1 }
 0x388   : > { %4122 = vst [vmem:[%s244_s11 + $0x38] sm:$0xff] %v4120_v33 }
 0x389   : > { %4460 = shalt.err (!%p4457_p5)
}
 0x38a   : > { %s4461_s14 = scalar_lea.hbm %s5512_s16, 1024  ;;  %s4465_s8 = scalar_lea.hbm %s5565_s5, 2048 }
 0x38b   : > { %p4462_p6 = scmp.ne.s32.totalorder %s5512_s16, %s4461_s14  ;;  %p4466_p10 = scmp.lt.s32.totalorder %s5512_s16, %s5565_s5 }
 0x38c   : > { %p4467_p11 = scmp.lt.s32.totalorder %s4465_s8, %s4461_s14 }
 0x38d   : > { %p4463_p7 = pnand %p4462_p6, %p4605_p4 }
 0x38e   : > { %p4468_p12 = por %p4467_p11, %p4466_p10 }
 0x38f   : > { %p4464_p9 = pneg %p4463_p7 }
 0x391   : > { %p4469_p13 = pnand %p4468_p12, %p4464_p9 }
 0x393   : > { %4472 = shalt.err (!%p4469_p13)
}
 0x394   : > { %4380 = dma.vmem_to_hbm [thread:$0]  (%p4605_p4), %s5514_s12, 1024, %s5512_s16, %s4124_s17  }
 0x395 PF: > { %p4386_p0 = scmp.ge.s32.totalorder %s4523_s23, 2  ;;  %s4152_s11 = sand.u32 1, %s4503_s18  }
 0x396   : > { %s4153_s21 = scalar_lea.sflag [#allocation3], %s4152_s11 }
 0x397   : > { %p4383_p1 = pnand %p4386_p0, %p4612_p8 }
 0x399   : > { %p4384_p2 = pneg %p4383_p1 }
 0x39b   : > { %4498 = dma.done.wait (%p4384_p2), %s4153_s21, 1024  }
 0x39c   : > { %4500 = vsyncadd (%p4384_p2), %s4153_s21, 4294966272  ;;  %s18_s23 = sadd.s32 1, %s4523_s23   ;;  %s5568_s18 = smov %s4507_s19 }
 0x39d   : > { %p15_p3 = scmp.ge.s32.totalorder %s18_s23, 4   ;;  %s5569_s19 = smov %s4511_s20 }
 0x39e   : > { %s5570_s20 = smov %s4618_s6  ;;  %s5571_s21 = smov %s4519_s22 }
 0x39f   : > { %s5572_s22 = smov %s5574_s26  ;;  %17 = sbr.rel (!%p15_p3) target bundleno = 4 (0x4), region = 86 }
 0x3a4   :  { %4158 = vsyncpa [#allocation3], 1 }
 0x3a5   :  { %4160 = vsyncpa [#allocation3 + $0x1], 1 }

</bundles_post_ra>
